<compile_context>
chip_gen: v7x
topology: tpu7x:2x2x1
jax: 0.10.0
libtpu: 0.0.40
codegen_flags: <defaults>
</compile_context>

<pallas_src>
import jax
import jax.numpy as jnp
from jax.experimental import pallas as pl
from jax.experimental.pallas import tpu as pltpu


def _level_latency_decoder_kernel(
    adj_ref,       # [G, N, N]      i8    dense bidirected adjacency (adj[i,j]=1 iff edge j->i)
    z_ref,         # [G, N, F]      bf16  z_latency
    op_ids_ref,    # [G, N, 1]      i32   g.ndata['operation_id']
    gat_wf_ref,    # [Lyr, F, F+2]  bf16  fused [W | W @ [attn_r | attn_l^T]]
    gat_b_ref,     # [Lyr, 1, F]    f32   GATConv bias
    w_head_ref,    # [F, 2*L*L]     bf16  [W_mu | W_logvar] @ R   (per-k repeated)
    b_head_ref,    # [1, 2*L*L]     f32   [b_mu | b_logvar] @ R
    emb_ref,       # [V, 2*L*L]     bf16  op-wise embedding, [mu block | logvar block], k-major
    s_mat_ref,     # [2*L*L, OUTW]  bf16  0/1 reduce-over-k matrix (lane-padded)
    out_ref,       # [G, N, OUTW]   f32   [mu | logvar | zero pad]
):
    G, N, _ = adj_ref.shape
    F = z_ref.shape[2]
    GN = G * N
    num_layers = gat_wf_ref.shape[0]
    V = emb_ref.shape[0]

    neg_inf = jnp.float32(-1e30)
    adj = adj_ref[...].astype(jnp.float32)                              # [G, N, N]
    mask_bias = jnp.where(adj > 0.0, 0.0, neg_inf)                      # loop-invariant
    has_edge = jnp.max(adj, axis=2, keepdims=True) > 0.0                # [G, N, 1]

    y = z_ref[...].reshape(GN, F)                                       # bf16 at layer 0

    # ---- stacked GATConv(1 head) layers, each followed by F.relu --------------------
    for layer in range(num_layers):                                     # static unroll
        wf = gat_wf_ref[layer]                                          # [F, F+2]  bf16
        b = gat_b_ref[layer]                                            # [1, F]    f32

        # one MXU pass: columns [0:F] = h, F = er (dst score), F+1 = el (src score)
        hs = jnp.dot(y.astype(jnp.bfloat16), wf,
                     preferred_element_type=jnp.float32)                # [GN, F+2] f32
        h = hs[:, :F]
        hb = h.astype(jnp.bfloat16).reshape(G, N, F)
        scg = hs[:, F:F + 2].reshape(G, N, 2)
        er = scg[:, :, 0:1]                                             # [G, N, 1]
        el = jnp.transpose(scg[:, :, 1:2], (0, 2, 1))                   # [G, 1, N]

        # e[g, i, j] = leaky_relu(er[i] + el[j]) for edge j -> i (negative_slope = 0.2)
        e = er + el                                                     # [G, N, N]
        e = jnp.where(e > 0, e, 0.2 * e) + mask_bias

        # per-destination edge softmax; masked logits are -1e30 so exp underflows to 0
        m = jnp.max(e, axis=2, keepdims=True)                           # [G, N, 1]
        p = jnp.exp(e - m)                                              # [G, N, N]
        s = jnp.sum(p, axis=2, keepdims=True)                           # [G, N, 1]

        # aggregate first, normalize after (scales [N,F] rows instead of [N,N] alpha)
        rst = jnp.einsum("gij,gjf->gif", p.astype(jnp.bfloat16), hb,
                         preferred_element_type=jnp.float32)            # [G, N, F]
        inv = jnp.where(has_edge,
                        pl.reciprocal(jnp.maximum(s, 1e-20), approx=True), 0.0)
        y = jnp.maximum((rst * inv).reshape(GN, F) + b, 0.0)            # bias + relu, f32

    # ---- fused + per-k-repeated heads: mlv_rep[n, k*L+j] = mu[n,k]; [.., LL+k*L+j] = logvar[n,k]
    mlv_rep = jnp.dot(y.astype(jnp.bfloat16), w_head_ref[...],
                      preferred_element_type=jnp.float32) + b_head_ref[...]   # [GN, 2LL]

    # ---- op-wise embedding gather as one-hot matmul ----------------------------------
    ids = op_ids_ref[...].reshape(GN, 1)                                # i32
    cols = jax.lax.broadcasted_iota(jnp.int32, (GN, V), 1)
    onehot = (cols == ids).astype(jnp.bfloat16)                         # [GN, V]
    w_ops = jnp.dot(onehot, emb_ref[...],
                    preferred_element_type=jnp.float32)                 # [GN, 2LL]

    # ---- out[n, j] = sum_k mu[n,k]*emb_mu[op,k,j]  (and logvar block), via S-matrix ---
    prod = (mlv_rep * w_ops).astype(jnp.bfloat16)                       # [GN, 2LL]
    out = jnp.dot(prod, s_mat_ref[...],
                  preferred_element_type=jnp.float32)                   # [GN, OUTW]
    out_ref[...] = out.reshape(G, N, -1)                                # lane-dense store


def init_params(key, feature_size, latency_len, num_layers, vocab):
    """Deterministic synthetic parameters (shapes follow the PyTorch __init__)."""
    ks = jax.random.split(key, 9)
    s = 0.1
    f, l = feature_size, latency_len
    return {
        "gat_w":  jax.random.normal(ks[0], (num_layers, f, f), jnp.float32) * s,
        "gat_al": jax.random.normal(ks[1], (num_layers, 1, f), jnp.float32) * s,
        "gat_ar": jax.random.normal(ks[2], (num_layers, f, 1), jnp.float32) * s,
        "gat_b":  jax.random.normal(ks[3], (num_layers, 1, f), jnp.float32) * s,
        "w_mu":   jax.random.normal(ks[4], (f, l), jnp.float32) * s,
        "b_mu":   jax.random.normal(ks[5], (1, l), jnp.float32) * s,
        "w_lv":   jax.random.normal(ks[6], (f, l), jnp.float32) * s,
        "b_lv":   jax.random.normal(ks[7], (1, l), jnp.float32) * s,
        "emb":    jax.random.normal(ks[8], (vocab, 2 * l * l), jnp.float32) * s,
    }


def _pick_graphs_per_step(b, n, target_rows=256):
    """Largest divisor G of B with B//G >= 2 grid steps (keep both v7x TCs busy) and
    G*N rows <= target (MXU row occupancy without blowing up the [G,N,N] attention)."""
    g = 1
    for cand in range(1, b + 1):
        if b % cand == 0 and b // cand >= 2 and cand * n <= target_rows:
            g = cand
    return g


def level_latency_decoder(adj, z_latency, op_ids, params, graphs_per_step=None):
    """Batched forward over B independent graphs.

    adj:       [B, N, N] symmetric 0/1 adjacency (dense dgl.to_bidirected graphs)
    z_latency: [B, N, 1, F]
    op_ids:    [B, N] int
    returns (mu, logvar), each [B, N, 1, L].
    """
    b, n, _, f = z_latency.shape
    l = params["w_mu"].shape[1]
    ll = l * l
    layers = params["gat_w"].shape[0]
    v = params["emb"].shape[0]
    out_w = ((2 * l + 127) // 128) * 128          # lane-dense padded output width

    g = _pick_graphs_per_step(b, n) if graphs_per_step is None else graphs_per_step
    assert b % g == 0, "batch must be divisible by graphs_per_step"

    # ---- host-side fusions / re-layouts / bf16 casts ---------------------------------
    adj_i8 = (adj != 0).astype(jnp.int8)                                 # mask only: 4x less DMA
    z3 = z_latency.reshape(b, n, f).astype(jnp.bfloat16)
    ids3 = op_ids.reshape(b, n, 1).astype(jnp.int32)

    # fused GAT weight: one matmul yields [h | er | el]  (scores = (y@W)@arl = y@(W@arl))
    arl = jnp.concatenate(
        [params["gat_ar"], jnp.transpose(params["gat_al"], (0, 2, 1))], axis=-1)   # [Lyr, F, 2]
    w_arl = jnp.einsum("lfg,lgt->lft", params["gat_w"], arl)                       # [Lyr, F, 2]
    gat_wf = jnp.concatenate([params["gat_w"], w_arl], axis=-1).astype(jnp.bfloat16)  # [Lyr,F,F+2]
    gat_b = params["gat_b"].astype(jnp.float32)

    # per-k repeat matrix R [2L, 2LL]: (w_head @ R)[f, k*L+j] = w_mu[f,k] (mu block), etc.
    r_core = jnp.kron(jnp.eye(l, dtype=jnp.float32), jnp.ones((1, l), jnp.float32))  # [L, LL]
    z_l_ll = jnp.zeros((l, ll), jnp.float32)
    r_mat = jnp.concatenate(
        [jnp.concatenate([r_core, z_l_ll], axis=1),
         jnp.concatenate([z_l_ll, r_core], axis=1)], axis=0)                         # [2L, 2LL]
    w_head = jnp.concatenate([params["w_mu"], params["w_lv"]], axis=-1)              # [F, 2L]
    b_head = jnp.concatenate([params["b_mu"], params["b_lv"]], axis=-1)              # [1, 2L]
    w_head_rep = (w_head @ r_mat).astype(jnp.bfloat16)                               # [F, 2LL]
    b_head_rep = (b_head @ r_mat).astype(jnp.float32)                                # [1, 2LL]

    # reduce-over-k matrix S [2LL, out_w]: out[:, j] = sum_k prod[:, k*L+j] (mu), L+j (logvar)
    s_core = jnp.tile(jnp.eye(l, dtype=jnp.float32), (l, 1))                         # [LL, L]
    z_ll_l = jnp.zeros((ll, l), jnp.float32)
    s_mat = jnp.concatenate(
        [jnp.concatenate([s_core, z_ll_l], axis=1),
         jnp.concatenate([z_ll_l, s_core], axis=1)], axis=0)                         # [2LL, 2L]
    s_mat = jnp.pad(s_mat, ((0, 0), (0, out_w - 2 * l))).astype(jnp.bfloat16)        # [2LL, out_w]

    # op-wise embedding reordered into [mu block | logvar block], k-major columns
    emb3 = params["emb"].reshape(v, l, 2 * l)
    emb_ops = jnp.concatenate(
        [emb3[:, :, :l].reshape(v, ll), emb3[:, :, l:].reshape(v, ll)], axis=-1
    ).astype(jnp.bfloat16)                                                           # [V, 2LL]

    grid_spec = pltpu.PrefetchScalarGridSpec(
        num_scalar_prefetch=0,
        grid=(b // g,),
        in_specs=[
            pl.BlockSpec((g, n, n), lambda i: (i, 0, 0)),               # adjacency mask (i8)
            pl.BlockSpec((g, n, f), lambda i: (i, 0, 0)),               # z_latency (bf16)
            pl.BlockSpec((g, n, 1), lambda i: (i, 0, 0)),               # op ids
            pl.BlockSpec((layers, f, f + 2), lambda i: (0, 0, 0)),      # fused GAT weights
            pl.BlockSpec((layers, 1, f), lambda i: (0, 0, 0)),          # GAT bias
            pl.BlockSpec((f, 2 * ll), lambda i: (0, 0)),                # repeated head W
            pl.BlockSpec((1, 2 * ll), lambda i: (0, 0)),                # repeated head b
            pl.BlockSpec((v, 2 * ll), lambda i: (0, 0)),                # op-wise embedding
            pl.BlockSpec((2 * ll, out_w), lambda i: (0, 0)),            # reduce-over-k matrix
        ],
        out_specs=pl.BlockSpec((g, n, out_w), lambda i: (i, 0, 0)),
    )

    out = pl.pallas_call(
        _level_latency_decoder_kernel,
        out_shape=jax.ShapeDtypeStruct((b, n, out_w), jnp.float32),
        grid_spec=grid_spec,
        compiler_params=pltpu.CompilerParams(
            dimension_semantics=("parallel",),
            vmem_limit_bytes=32 * 1024 * 1024),
    )(adj_i8, z3, ids3, gat_wf, gat_b, w_head_rep, b_head_rep, emb_ops, s_mat)

    mu = out[:, :, :l].reshape(b, n, 1, l)
    logvar = out[:, :, l:2 * l].reshape(b, n, 1, l)
    return mu, logvar


def _reference_forward(adj, z_latency, op_ids, params):
    """Pure-JAX f32 reference of the PyTorch forward (dense GAT formulation)."""
    b, n, _, f = z_latency.shape
    l = params["w_mu"].shape[1]
    y = z_latency.reshape(b, n, f).astype(jnp.float32)
    mask = adj > 0
    for layer in range(params["gat_w"].shape[0]):
        w = params["gat_w"][layer]
        al = params["gat_al"][layer][0]      # [F]
        ar = params["gat_ar"][layer][:, 0]   # [F]
        bias = params["gat_b"][layer]        # [1, F]
        h = jnp.einsum("bnf,fg->bng", y, w)
        el = jnp.einsum("bnf,f->bn", h, al)  # src scores
        er = jnp.einsum("bnf,f->bn", h, ar)  # dst scores
        e = er[:, :, None] + el[:, None, :]
        e = jnp.where(e > 0, e, 0.2 * e)
        e = jnp.where(mask, e, -1e30)
        m = jnp.max(e, axis=-1, keepdims=True)
        p = jnp.where(mask, jnp.exp(e - m), 0.0)
        s = jnp.sum(p, axis=-1, keepdims=True)
        alpha = p / jnp.maximum(s, 1e-20)
        y = jnp.maximum(jnp.einsum("bij,bjf->bif", alpha, h) + bias, 0.0)
    mu = jnp.einsum("bnf,fl->bnl", y, params["w_mu"]) + params["b_mu"]
    lv = jnp.einsum("bnf,fl->bnl", y, params["w_lv"]) + params["b_lv"]
    w_ops = params["emb"][op_ids].reshape(b, n, l, 2 * l)
    mu_out = jnp.einsum("bnk,bnkj->bnj", mu, w_ops[..., :l])
    lv_out = jnp.einsum("bnk,bnkj->bnj", lv, w_ops[..., l:])
    return mu_out.reshape(b, n, 1, l), lv_out.reshape(b, n, 1, l)


if __name__ == "__main__":
    # Small config: latency_feature_size=32, latency_feature_length=8,
    # latency_gcn_layers=2, operation_cnt=15 (vocab=16), 8 graphs of 16 nodes each
    # (exercises the multi-graph-per-step path: G=4, grid=(2,)).
    B, N, F, L, LAYERS, OP_CNT = 8, 16, 32, 8, 2, 15
    V = OP_CNT + 1

    key = jax.random.PRNGKey(0)
    k_param, k_z = jax.random.split(key)
    params = init_params(k_param, F, L, LAYERS, V)

    # Deterministic small bidirected graphs: ring plus a few chords, symmetrized
    # (mirrors dgl.to_bidirected on a dense adjacency). Every node has >= 1 edge.
    def ring_adj(n, chords):
        src = list(range(n)) + [c[0] for c in chords]
        dst = [(i + 1) % n for i in range(n)] + [c[1] for c in chords]
        a = jnp.zeros((n, n), jnp.float32)
        a = a.at[jnp.array(dst), jnp.array(src)].set(1.0)
        return jnp.maximum(a, a.T)

    chord_sets = [
        [(0, 8), (2, 10), (4, 12), (6, 14)],
        [(1, 9), (3, 7), (5, 13)],
        [(0, 5), (10, 15)],
        [(2, 9), (4, 11), (6, 13)],
        [(1, 8), (3, 12)],
        [(0, 7), (5, 10), (9, 14)],
        [(2, 13), (6, 11)],
        [(1, 4), (7, 12), (3, 14)],
    ]
    adj = jnp.stack([ring_adj(N, cs) for cs in chord_sets])
    z_latency = jax.random.normal(k_z, (B, N, 1, F), jnp.float32)
    op_ids = (jnp.arange(B * N, dtype=jnp.int32) % V).reshape(B, N)

    mu, logvar = level_latency_decoder(adj, z_latency, op_ids, params)
    jax.block_until_ready((mu, logvar))

    assert mu.shape == (B, N, 1, L) and logvar.shape == (B, N, 1, L)
    assert bool(jnp.all(jnp.isfinite(mu))) and bool(jnp.all(jnp.isfinite(logvar)))

    # Sanity check against a pure-JAX f32 reference (loose tol: bf16 MXU operands).
    mu_ref, lv_ref = _reference_forward(adj, z_latency, op_ids, params)
    err = max(float(jnp.max(jnp.abs(mu - mu_ref))),
              float(jnp.max(jnp.abs(logvar - lv_ref))))
    assert err < 1e-2, f"max abs error vs reference: {err}"

    print("KERNEL_OK")
</pallas_src>

<mosaic_0001>
module attributes {stable_mosaic.version = 11 : i64} {
  func.func @_level_latency_decoder_kernel(%arg0: i32, %arg1: memref<4x16x16xi8, #tpu.memory_space<vmem>>, %arg2: memref<4x16x32xbf16, #tpu.memory_space<vmem>>, %arg3: memref<4x16x1xi32, #tpu.memory_space<vmem>>, %arg4: memref<2x32x34xbf16, #tpu.memory_space<vmem>>, %arg5: memref<2x1x32xf32, #tpu.memory_space<vmem>>, %arg6: memref<32x128xbf16, #tpu.memory_space<vmem>>, %arg7: memref<1x128xf32, #tpu.memory_space<vmem>>, %arg8: memref<16x128xbf16, #tpu.memory_space<vmem>>, %arg9: memref<128x128xbf16, #tpu.memory_space<vmem>>, %arg10: memref<4x16x128xf32, #tpu.memory_space<vmem>>) attributes {dimension_semantics = [#tpu.dimension_semantics<parallel>], iteration_bounds = array<i64: 2>, scalar_prefetch = 0 : i64, scratch_operands = 0 : i64, tpu.core_type = #tpu.core_type<tc>, window_params = [{transform_indices = @transform_0, window_bounds = array<i64: 4, 16, 16>}, {transform_indices = @transform_1, window_bounds = array<i64: 4, 16, 32>}, {transform_indices = @transform_2, window_bounds = array<i64: 4, 16, 1>}, {pipeline_mode = #tpu.pipeline_mode<synchronous>, transform_indices = @transform_3, window_bounds = array<i64: 2, 32, 34>}, {pipeline_mode = #tpu.pipeline_mode<synchronous>, transform_indices = @transform_4, window_bounds = array<i64: 2, 1, 32>}, {pipeline_mode = #tpu.pipeline_mode<synchronous>, transform_indices = @transform_5, window_bounds = array<i64: 32, 128>}, {pipeline_mode = #tpu.pipeline_mode<synchronous>, transform_indices = @transform_6, window_bounds = array<i64: 1, 128>}, {pipeline_mode = #tpu.pipeline_mode<synchronous>, transform_indices = @transform_7, window_bounds = array<i64: 16, 128>}, {pipeline_mode = #tpu.pipeline_mode<synchronous>, transform_indices = @transform_8, window_bounds = array<i64: 128, 128>}, {transform_indices = @transform_9, window_bounds = array<i64: 4, 16, 128>}]} {
    %c0 = arith.constant 0 : index
    %c0_0 = arith.constant 0 : index
    %c0_1 = arith.constant 0 : index
    %0 = vector.load %arg1[%c0, %c0_0, %c0_1] : memref<4x16x16xi8, #tpu.memory_space<vmem>>, vector<4x16x16xi8>
    %1 = arith.sitofp %0 : vector<4x16x16xi8> to vector<4x16x16xf32>
    %cst = arith.constant 0.000000e+00 : f32
    %2 = vector.broadcast %cst : f32 to vector<4x16x16xf32>
    %3 = arith.cmpf ogt, %1, %2 : vector<4x16x16xf32>
    %cst_2 = arith.constant 0.000000e+00 : f32
    %cst_3 = arith.constant -1.000000e+30 : f32
    %4 = vector.broadcast %cst_2 : f32 to vector<4x16x16xf32>
    %5 = vector.broadcast %cst_3 : f32 to vector<4x16x16xf32>
    %6 = arith.select %3, %4, %5 : vector<4x16x16xi1>, vector<4x16x16xf32>
    %cst_4 = arith.constant dense<0xFF800000> : vector<4x16xf32>
    %7 = vector.multi_reduction <maximumf>, %1, %cst_4 [2] : vector<4x16x16xf32> to vector<4x16xf32>
    %8 = vector.shape_cast %7 : vector<4x16xf32> to vector<4x16x1xf32>
    %cst_5 = arith.constant 0.000000e+00 : f32
    %9 = vector.broadcast %cst_5 : f32 to vector<4x16x1xf32>
    %10 = arith.cmpf ogt, %8, %9 : vector<4x16x1xf32>
    %c0_6 = arith.constant 0 : index
    %c0_7 = arith.constant 0 : index
    %c0_8 = arith.constant 0 : index
    %11 = vector.load %arg2[%c0_6, %c0_7, %c0_8] : memref<4x16x32xbf16, #tpu.memory_space<vmem>>, vector<4x16x32xbf16>
    %12 = vector.shape_cast %11 : vector<4x16x32xbf16> to vector<64x32xbf16>
    %c0_9 = arith.constant 0 : index
    %c0_10 = arith.constant 0 : index
    %c0_11 = arith.constant 0 : index
    %13 = vector.load %arg4[%c0_9, %c0_10, %c0_11] : memref<2x32x34xbf16, #tpu.memory_space<vmem>>, vector<1x32x34xbf16>
    %14 = vector.shape_cast %13 : vector<1x32x34xbf16> to vector<32x34xbf16>
    %c0_12 = arith.constant 0 : index
    %c0_13 = arith.constant 0 : index
    %c0_14 = arith.constant 0 : index
    %15 = vector.load %arg5[%c0_12, %c0_13, %c0_14] : memref<2x1x32xf32, #tpu.memory_space<vmem>>, vector<1x1x32xf32>
    %16 = vector.shape_cast %15 : vector<1x1x32xf32> to vector<1x32xf32>
    %cst_15 = arith.constant dense<0.000000e+00> : vector<64x34xf32>
    %17 = tpu.matmul %12, %14, %cst_15 {dimension_numbers = #tpu.dot_dimension_numbers<[1], [0], [0], [1], [0, 0, 1, 1], [], []>} : vector<64x32xbf16>, vector<32x34xbf16>, vector<64x34xf32> -> vector<64x34xf32>
    %18 = vector.extract_strided_slice %17 {offsets = [0, 0], sizes = [64, 32], strides = [1, 1]} : vector<64x34xf32> to vector<64x32xf32>
    %19 = arith.truncf %18 : vector<64x32xf32> to vector<64x32xbf16>
    %20 = vector.shape_cast %19 : vector<64x32xbf16> to vector<4x16x32xbf16>
    %21 = vector.extract_strided_slice %17 {offsets = [0, 32], sizes = [64, 2], strides = [1, 1]} : vector<64x34xf32> to vector<64x2xf32>
    %22 = vector.shape_cast %21 : vector<64x2xf32> to vector<4x16x2xf32>
    %23 = vector.extract_strided_slice %22 {offsets = [0, 0, 0], sizes = [4, 16, 1], strides = [1, 1, 1]} : vector<4x16x2xf32> to vector<4x16x1xf32>
    %24 = vector.extract_strided_slice %22 {offsets = [0, 0, 1], sizes = [4, 16, 1], strides = [1, 1, 1]} : vector<4x16x2xf32> to vector<4x16x1xf32>
    %25 = tpu.transpose %24, [0, 2, 1] : vector<4x16x1xf32> -> vector<4x1x16xf32>
    %26 = vector.broadcast %23 : vector<4x16x1xf32> to vector<4x16x16xf32>
    %27 = vector.broadcast %25 : vector<4x1x16xf32> to vector<4x16x16xf32>
    %28 = arith.addf %26, %27 : vector<4x16x16xf32>
    %cst_16 = arith.constant 0.000000e+00 : f32
    %29 = vector.broadcast %cst_16 : f32 to vector<4x16x16xf32>
    %30 = arith.cmpf ogt, %28, %29 : vector<4x16x16xf32>
    %cst_17 = arith.constant 2.000000e-01 : f32
    %31 = vector.broadcast %cst_17 : f32 to vector<4x16x16xf32>
    %32 = arith.mulf %31, %28 : vector<4x16x16xf32>
    %33 = arith.select %30, %28, %32 : vector<4x16x16xi1>, vector<4x16x16xf32>
    %34 = arith.addf %33, %6 : vector<4x16x16xf32>
    %cst_18 = arith.constant dense<0xFF800000> : vector<4x16xf32>
    %35 = vector.multi_reduction <maximumf>, %34, %cst_18 [2] : vector<4x16x16xf32> to vector<4x16xf32>
    %36 = vector.shape_cast %35 : vector<4x16xf32> to vector<4x16x1xf32>
    %37 = vector.broadcast %36 : vector<4x16x1xf32> to vector<4x16x16xf32>
    %38 = arith.subf %34, %37 : vector<4x16x16xf32>
    %39 = math.exp %38 : vector<4x16x16xf32>
    %cst_19 = arith.constant dense<0.000000e+00> : vector<4x16xf32>
    %40 = vector.multi_reduction <add>, %39, %cst_19 [2] : vector<4x16x16xf32> to vector<4x16xf32>
    %41 = vector.shape_cast %40 : vector<4x16xf32> to vector<4x16x1xf32>
    %42 = arith.truncf %39 : vector<4x16x16xf32> to vector<4x16x16xbf16>
    "tpu.trace_start"() <{level = 10 : i32, message = "gij,gjf->gif"}> : () -> ()
    %cst_20 = arith.constant dense<0.000000e+00> : vector<4x16x32xf32>
    %43 = tpu.matmul %42, %20, %cst_20 {dimension_numbers = #tpu.dot_dimension_numbers<[2], [1], [1], [2], [0, 0, 0, 1, 1, 2], [0], [0]>} : vector<4x16x16xbf16>, vector<4x16x32xbf16>, vector<4x16x32xf32> -> vector<4x16x32xf32>
    "tpu.trace_stop"() : () -> ()
    %cst_21 = arith.constant 9.99999968E-21 : f32
    %44 = vector.broadcast %cst_21 : f32 to vector<4x16x1xf32>
    %45 = arith.maximumf %41, %44 : vector<4x16x1xf32>
    %46 = tpu.reciprocal %45 {approx = true} : vector<4x16x1xf32> -> vector<4x16x1xf32>
    %cst_22 = arith.constant 0.000000e+00 : f32
    %47 = vector.broadcast %cst_22 : f32 to vector<4x16x1xf32>
    %48 = arith.select %10, %46, %47 : vector<4x16x1xi1>, vector<4x16x1xf32>
    %49 = vector.broadcast %48 : vector<4x16x1xf32> to vector<4x16x32xf32>
    %50 = arith.mulf %43, %49 : vector<4x16x32xf32>
    %51 = vector.shape_cast %50 : vector<4x16x32xf32> to vector<64x32xf32>
    %52 = vector.broadcast %16 : vector<1x32xf32> to vector<64x32xf32>
    %53 = arith.addf %51, %52 : vector<64x32xf32>
    %cst_23 = arith.constant 0.000000e+00 : f32
    %54 = vector.broadcast %cst_23 : f32 to vector<64x32xf32>
    %55 = arith.maximumf %53, %54 : vector<64x32xf32>
    %c1 = arith.constant 1 : index
    %c0_24 = arith.constant 0 : index
    %c0_25 = arith.constant 0 : index
    %56 = vector.load %arg4[%c1, %c0_24, %c0_25] : memref<2x32x34xbf16, #tpu.memory_space<vmem>>, vector<1x32x34xbf16>
    %57 = vector.shape_cast %56 : vector<1x32x34xbf16> to vector<32x34xbf16>
    %c1_26 = arith.constant 1 : index
    %c0_27 = arith.constant 0 : index
    %c0_28 = arith.constant 0 : index
    %58 = vector.load %arg5[%c1_26, %c0_27, %c0_28] : memref<2x1x32xf32, #tpu.memory_space<vmem>>, vector<1x1x32xf32>
    %59 = vector.shape_cast %58 : vector<1x1x32xf32> to vector<1x32xf32>
    %60 = arith.truncf %55 : vector<64x32xf32> to vector<64x32xbf16>
    %cst_29 = arith.constant dense<0.000000e+00> : vector<64x34xf32>
    %61 = tpu.matmul %60, %57, %cst_29 {dimension_numbers = #tpu.dot_dimension_numbers<[1], [0], [0], [1], [0, 0, 1, 1], [], []>} : vector<64x32xbf16>, vector<32x34xbf16>, vector<64x34xf32> -> vector<64x34xf32>
    %62 = vector.extract_strided_slice %61 {offsets = [0, 0], sizes = [64, 32], strides = [1, 1]} : vector<64x34xf32> to vector<64x32xf32>
    %63 = arith.truncf %62 : vector<64x32xf32> to vector<64x32xbf16>
    %64 = vector.shape_cast %63 : vector<64x32xbf16> to vector<4x16x32xbf16>
    %65 = vector.extract_strided_slice %61 {offsets = [0, 32], sizes = [64, 2], strides = [1, 1]} : vector<64x34xf32> to vector<64x2xf32>
    %66 = vector.shape_cast %65 : vector<64x2xf32> to vector<4x16x2xf32>
    %67 = vector.extract_strided_slice %66 {offsets = [0, 0, 0], sizes = [4, 16, 1], strides = [1, 1, 1]} : vector<4x16x2xf32> to vector<4x16x1xf32>
    %68 = vector.extract_strided_slice %66 {offsets = [0, 0, 1], sizes = [4, 16, 1], strides = [1, 1, 1]} : vector<4x16x2xf32> to vector<4x16x1xf32>
    %69 = tpu.transpose %68, [0, 2, 1] : vector<4x16x1xf32> -> vector<4x1x16xf32>
    %70 = vector.broadcast %67 : vector<4x16x1xf32> to vector<4x16x16xf32>
    %71 = vector.broadcast %69 : vector<4x1x16xf32> to vector<4x16x16xf32>
    %72 = arith.addf %70, %71 : vector<4x16x16xf32>
    %cst_30 = arith.constant 0.000000e+00 : f32
    %73 = vector.broadcast %cst_30 : f32 to vector<4x16x16xf32>
    %74 = arith.cmpf ogt, %72, %73 : vector<4x16x16xf32>
    %cst_31 = arith.constant 2.000000e-01 : f32
    %75 = vector.broadcast %cst_31 : f32 to vector<4x16x16xf32>
    %76 = arith.mulf %75, %72 : vector<4x16x16xf32>
    %77 = arith.select %74, %72, %76 : vector<4x16x16xi1>, vector<4x16x16xf32>
    %78 = arith.addf %77, %6 : vector<4x16x16xf32>
    %cst_32 = arith.constant dense<0xFF800000> : vector<4x16xf32>
    %79 = vector.multi_reduction <maximumf>, %78, %cst_32 [2] : vector<4x16x16xf32> to vector<4x16xf32>
    %80 = vector.shape_cast %79 : vector<4x16xf32> to vector<4x16x1xf32>
    %81 = vector.broadcast %80 : vector<4x16x1xf32> to vector<4x16x16xf32>
    %82 = arith.subf %78, %81 : vector<4x16x16xf32>
    %83 = math.exp %82 : vector<4x16x16xf32>
    %cst_33 = arith.constant dense<0.000000e+00> : vector<4x16xf32>
    %84 = vector.multi_reduction <add>, %83, %cst_33 [2] : vector<4x16x16xf32> to vector<4x16xf32>
    %85 = vector.shape_cast %84 : vector<4x16xf32> to vector<4x16x1xf32>
    %86 = arith.truncf %83 : vector<4x16x16xf32> to vector<4x16x16xbf16>
    "tpu.trace_start"() <{level = 10 : i32, message = "gij,gjf->gif"}> : () -> ()
    %cst_34 = arith.constant dense<0.000000e+00> : vector<4x16x32xf32>
    %87 = tpu.matmul %86, %64, %cst_34 {dimension_numbers = #tpu.dot_dimension_numbers<[2], [1], [1], [2], [0, 0, 0, 1, 1, 2], [0], [0]>} : vector<4x16x16xbf16>, vector<4x16x32xbf16>, vector<4x16x32xf32> -> vector<4x16x32xf32>
    "tpu.trace_stop"() : () -> ()
    %cst_35 = arith.constant 9.99999968E-21 : f32
    %88 = vector.broadcast %cst_35 : f32 to vector<4x16x1xf32>
    %89 = arith.maximumf %85, %88 : vector<4x16x1xf32>
    %90 = tpu.reciprocal %89 {approx = true} : vector<4x16x1xf32> -> vector<4x16x1xf32>
    %cst_36 = arith.constant 0.000000e+00 : f32
    %91 = vector.broadcast %cst_36 : f32 to vector<4x16x1xf32>
    %92 = arith.select %10, %90, %91 : vector<4x16x1xi1>, vector<4x16x1xf32>
    %93 = vector.broadcast %92 : vector<4x16x1xf32> to vector<4x16x32xf32>
    %94 = arith.mulf %87, %93 : vector<4x16x32xf32>
    %95 = vector.shape_cast %94 : vector<4x16x32xf32> to vector<64x32xf32>
    %96 = vector.broadcast %59 : vector<1x32xf32> to vector<64x32xf32>
    %97 = arith.addf %95, %96 : vector<64x32xf32>
    %cst_37 = arith.constant 0.000000e+00 : f32
    %98 = vector.broadcast %cst_37 : f32 to vector<64x32xf32>
    %99 = arith.maximumf %97, %98 : vector<64x32xf32>
    %100 = arith.truncf %99 : vector<64x32xf32> to vector<64x32xbf16>
    %c0_38 = arith.constant 0 : index
    %c0_39 = arith.constant 0 : index
    %101 = vector.load %arg6[%c0_38, %c0_39] : memref<32x128xbf16, #tpu.memory_space<vmem>>, vector<32x128xbf16>
    %cst_40 = arith.constant dense<0.000000e+00> : vector<64x128xf32>
    %102 = tpu.matmul %100, %101, %cst_40 {dimension_numbers = #tpu.dot_dimension_numbers<[1], [0], [0], [1], [0, 0, 1, 1], [], []>} : vector<64x32xbf16>, vector<32x128xbf16>, vector<64x128xf32> -> vector<64x128xf32>
    %c0_41 = arith.constant 0 : index
    %c0_42 = arith.constant 0 : index
    %103 = vector.load %arg7[%c0_41, %c0_42] : memref<1x128xf32, #tpu.memory_space<vmem>>, vector<1x128xf32>
    %104 = vector.broadcast %103 : vector<1x128xf32> to vector<64x128xf32>
    %105 = arith.addf %102, %104 : vector<64x128xf32>
    %c0_43 = arith.constant 0 : index
    %c0_44 = arith.constant 0 : index
    %c0_45 = arith.constant 0 : index
    %106 = vector.load %arg3[%c0_43, %c0_44, %c0_45] : memref<4x16x1xi32, #tpu.memory_space<vmem>>, vector<4x16x1xi32>
    %107 = vector.shape_cast %106 : vector<4x16x1xi32> to vector<64x1xi32>
    %108 = tpu.iota {dimensions = array<i32: 1>} : vector<64x16xi32>
    %109 = vector.broadcast %107 : vector<64x1xi32> to vector<64x16xi32>
    %110 = arith.cmpi eq, %108, %109 : vector<64x16xi32>
    %111 = arith.extui %110 : vector<64x16xi1> to vector<64x16xi32>
    %112 = arith.sitofp %111 : vector<64x16xi32> to vector<64x16xf32>
    %113 = arith.truncf %112 : vector<64x16xf32> to vector<64x16xbf16>
    %c0_46 = arith.constant 0 : index
    %c0_47 = arith.constant 0 : index
    %114 = vector.load %arg8[%c0_46, %c0_47] : memref<16x128xbf16, #tpu.memory_space<vmem>>, vector<16x128xbf16>
    %cst_48 = arith.constant dense<0.000000e+00> : vector<64x128xf32>
    %115 = tpu.matmul %113, %114, %cst_48 {dimension_numbers = #tpu.dot_dimension_numbers<[1], [0], [0], [1], [0, 0, 1, 1], [], []>} : vector<64x16xbf16>, vector<16x128xbf16>, vector<64x128xf32> -> vector<64x128xf32>
    %116 = arith.mulf %105, %115 : vector<64x128xf32>
    %117 = arith.truncf %116 : vector<64x128xf32> to vector<64x128xbf16>
    %c0_49 = arith.constant 0 : index
    %c0_50 = arith.constant 0 : index
    %118 = vector.load %arg9[%c0_49, %c0_50] : memref<128x128xbf16, #tpu.memory_space<vmem>>, vector<128x128xbf16>
    %cst_51 = arith.constant dense<0.000000e+00> : vector<64x128xf32>
    %119 = tpu.matmul %117, %118, %cst_51 {dimension_numbers = #tpu.dot_dimension_numbers<[1], [0], [0], [1], [0, 0, 1, 1], [], []>} : vector<64x128xbf16>, vector<128x128xbf16>, vector<64x128xf32> -> vector<64x128xf32>
    %120 = vector.shape_cast %119 : vector<64x128xf32> to vector<4x16x128xf32>
    %c0_52 = arith.constant 0 : index
    %c0_53 = arith.constant 0 : index
    %c0_54 = arith.constant 0 : index
    %121 = vector.load %arg10[%c0_52, %c0_53, %c0_54] : memref<4x16x128xf32, #tpu.memory_space<vmem>>, vector<4x16x128xf32>
    tpu.vector_store %arg10[%c0_52, %c0_53, %c0_54], %120 {strides = array<i32>} : memref<4x16x128xf32, #tpu.memory_space<vmem>>, vector<4x16x128xf32>,
    return
  }
  func.func @transform_0(%arg0: i32) -> (i32, i32, i32) {
    %c0_i32 = arith.constant 0 : i32
    %c0_i32_0 = arith.constant 0 : i32
    %c0_i32_1 = arith.constant 0 : i32
    return %arg0, %c0_i32, %c0_i32_0 : i32, i32, i32
  }
  func.func @transform_1(%arg0: i32) -> (i32, i32, i32) {
    %c0_i32 = arith.constant 0 : i32
    %c0_i32_0 = arith.constant 0 : i32
    %c0_i32_1 = arith.constant 0 : i32
    return %arg0, %c0_i32, %c0_i32_0 : i32, i32, i32
  }
  func.func @transform_2(%arg0: i32) -> (i32, i32, i32) {
    %c0_i32 = arith.constant 0 : i32
    %c0_i32_0 = arith.constant 0 : i32
    %c0_i32_1 = arith.constant 0 : i32
    return %arg0, %c0_i32, %c0_i32_0 : i32, i32, i32
  }
  func.func @transform_3(%arg0: i32) -> (i32, i32, i32) {
    %c0_i32 = arith.constant 0 : i32
    %c0_i32_0 = arith.constant 0 : i32
    %c0_i32_1 = arith.constant 0 : i32
    %c0_i32_2 = arith.constant 0 : i32
    return %c0_i32, %c0_i32_0, %c0_i32_1 : i32, i32, i32
  }
  func.func @transform_4(%arg0: i32) -> (i32, i32, i32) {
    %c0_i32 = arith.constant 0 : i32
    %c0_i32_0 = arith.constant 0 : i32
    %c0_i32_1 = arith.constant 0 : i32
    %c0_i32_2 = arith.constant 0 : i32
    return %c0_i32, %c0_i32_0, %c0_i32_1 : i32, i32, i32
  }
  func.func @transform_5(%arg0: i32) -> (i32, i32) {
    %c0_i32 = arith.constant 0 : i32
    %c0_i32_0 = arith.constant 0 : i32
    %c0_i32_1 = arith.constant 0 : i32
    return %c0_i32, %c0_i32_0 : i32, i32
  }
  func.func @transform_6(%arg0: i32) -> (i32, i32) {
    %c0_i32 = arith.constant 0 : i32
    %c0_i32_0 = arith.constant 0 : i32
    %c0_i32_1 = arith.constant 0 : i32
    return %c0_i32, %c0_i32_0 : i32, i32
  }
  func.func @transform_7(%arg0: i32) -> (i32, i32) {
    %c0_i32 = arith.constant 0 : i32
    %c0_i32_0 = arith.constant 0 : i32
    %c0_i32_1 = arith.constant 0 : i32
    return %c0_i32, %c0_i32_0 : i32, i32
  }
  func.func @transform_8(%arg0: i32) -> (i32, i32) {
    %c0_i32 = arith.constant 0 : i32
    %c0_i32_0 = arith.constant 0 : i32
    %c0_i32_1 = arith.constant 0 : i32
    return %c0_i32, %c0_i32_0 : i32, i32
  }
  func.func @transform_9(%arg0: i32) -> (i32, i32, i32) {
    %c0_i32 = arith.constant 0 : i32
    %c0_i32_0 = arith.constant 0 : i32
    %c0_i32_1 = arith.constant 0 : i32
    return %arg0, %c0_i32, %c0_i32_0 : i32, i32, i32
  }
}

</mosaic_0001>

<bundles_post_ra>
// kernel: tpu_custom_call.1
= control target key start
LH: loop header
LB: loop body
LE: loop exit
PB: predicated region body
PF: predicated region fallthrough
CT: control target
= control target key end

     0   :  { %14 = vsyncpa [#allocation3], 0  ;;  %s3599_s0 = inlined_call_operand.hbm [shape: s8[8,16,16], index: 0, kind: input, shape index: {}]   ;;  %s3600_s1 = inlined_call_operand.vmem [shape: bf16[8,16,32], index: 1, kind: input, shape index: {}]   ;;  %s3601_s2 = inlined_call_operand.vmem [shape: s32[8,16,1], index: 2, kind: input, shape index: {}]   ;;  %s3602_s3 = inlined_call_operand.hbm [shape: bf16[2,32,34], index: 3, kind: input, shape index: {}]   ;;  %s3603_s4 = inlined_call_operand.vmem [shape: f32[2,1,32], index: 4, kind: input, shape index: {}]   ;;  %s3604_s5 = inlined_call_operand.vmem [shape: bf16[32,128], index: 5, kind: input, shape index: {}]   ;;  %s3605_s6 = inlined_call_operand.vmem [shape: f32[1,128], index: 6, kind: input, shape index: {}]   ;;  %s3606_s7 = inlined_call_operand.vmem [shape: bf16[16,128], index: 7, kind: input, shape index: {}]   ;;  %s3607_s8 = inlined_call_operand.vmem [shape: bf16[128,128], index: 8, kind: input, shape index: {}]   ;;  %s3608_s9 = inlined_call_operand.hbm [shape: f32[8,16,128], index: 9, kind: output, shape index: {}]  }
   0x1   :  { %16 = vsyncpa [#allocation3 + $0x1], 0 }
   0x2   :  { %17 = vsyncpa [#allocation6], 0 }
   0x3   :  { %18 = vsyncpa [#allocation4], 0 }
   0x4   :  { %20 = vsyncpa [#allocation4 + $0x1], 0  ;;  %s2978_s30 = smov 0   ;;  %s2980_s10 = smov 0  }
   0x5   :  { %s2982_s11 = smov 0   ;;  %s2984_s12 = smov 0  }
   0x6 LB: > { %s2999_s13 = sadd.s32 4294967295, %s2911_s12   ;;  %s2354_s14 = sadd.s32 4294967294, %s2911_s12   ;;  %s2911_s12 = sphi %s2984_s12, %s3631_s12   ;;  %s2907_s11 = sphi %s2982_s11, %s3634_s11   ;;  %s2903_s10 = sphi %s2980_s10, %s3633_s10   ;;  %s2899_s30 = sphi %s2978_s30, %s3632_s30  }
   0x7   : > { %p46_p0 = scmp.ne.s32.totalorder %s2903_s10, %s2899_s30  ;;  %p3609_p1 = scmp.eq.s32.totalorder %s2999_s13, 0 }
   0x8   : > { %p254_p3 = scmp.eq.s32.totalorder %s2354_s14, 1  ;;  %p2355_p5 = scmp.ge.s32.totalorder %s2911_s12, 1 }
   0x9   : > { %p3008_p4 = por %p3609_p1, %p46_p0  ;;  %p261_p7 = scmp.lt.s32.totalorder %s2911_s12, 3 }
   0xa   : > { %p3013_p6 = por %p254_p3, %p46_p0  ;;  %s2913_s18 = smov [#allocation5]  }
   0xb   : > { %s3615_s15 = scalar_select %p3008_p4, 1, 0 }
   0xc   : > { %s3616_s16 = scalar_select %p3013_p6, 1, 0 }
   0xd   : > { %p3018_p8 = pnand %p2355_p5, %p261_p7  ;;  %s273_s19 = sshll.u32 %s2913_s18, 4  ;;  %s3022_s19 = int_to_ptr.vmem [resolvable:$true] %s273_s19 }
   0xe   : > { %3617 = sst [smem:[#allocation11_spill]] %s3616_s16  ;;  %s3034_s21 = sadd.s32 1, %s2911_s12  }
   0xf   : > { %s3618_s17 = scalar_select %p3018_p8, 1, 0 }
  0x10   : > { %p2635_p9 = pneg %p3018_p8  ;;  %3620 = sst [smem:[#allocation12_spill]] %s3034_s21 }
  0x11   : > { %s33_s22 = sadd.s32 1, %s2907_s11  ;;  %s30_s23 = ssub.s32 %s2911_s12, %s3034_s21 }
  0x12   : > { %p3029_p11 = pnand %p2635_p9, %p3609_p1  ;;  %s2783_s26 = scalar_lea.hbm %s3602_s3, 512 }
  0x13   : > { %p2784_p12 = scmp.ne.s32.totalorder %s3602_s3, %s2783_s26  ;;  %p2790_p5 = scmp.lt.u32.totalorder %s2783_s26, %s3602_s3 }
  0x14   : > { %p2785_p13 = pneg %p3029_p11 }
  0x16   : > { %p2786_p0 = pnand %p2785_p13, %p2784_p12 }
  0x18   : > { %p2787_p3 = pneg %p2786_p0 }
  0x1a   : > { %p2792_p7 = pnand %p2790_p5, %p2787_p3 }
  0x1c   : > { %2795 = shalt.err (!%p2792_p7)
}
  0x1d   : > { %s2796_s18 = scalar_lea.vmem %s3022_s19, 512  ;;  %p2804_p2 = scmp.lt.s32.totalorder %s3022_s19, %s3022_s19 }
  0x1e   : > { %p2797_p9 = scmp.ne.s32.totalorder %s3022_s19, %s2796_s18  ;;  %p2805_p6 = scmp.lt.s32.totalorder %s2796_s18, %s2796_s18 }
  0x20   : > { %p2799_p10 = pnand %p2797_p9, %p2785_p13  ;;  %p2806_p4 = por %p2805_p6, %p2804_p2 }
  0x22   : > { %p2800_p1 = pneg %p2799_p10 }
  0x24   : > { %p2807_p8 = pnand %p2806_p4, %p2800_p1 }
  0x26   : > { %2810 = shalt.err (!%p2807_p8)
}
  0x27   : > { %s2914_s24 = smov 64   ;;  %s2915_s25 = smov 4  }
  0x28   : > { %2638 = dma.hbm_to_vmem [thread:$0]  (!%p3029_p11), %s3602_s3, 512, %s3022_s19, [#allocation6], %s2914_s24, %s2914_s24, %s2915_s25  }
  0x29   : > { %p31_p2 = scmp.eq.s32.totalorder %s30_s23, 0  ;;  %p40_p1 = scmp.ne.s32.totalorder %s2907_s11, %s2903_s10 }
  0x2a   : > { %p41_p4 = scmp.eq.s32.totalorder %s2911_s12, 0  ;;  %p2648_p6 = scmp.lt.s32.totalorder %s2911_s12, 2 }
  0x2b   : > { %s3065_s28 = scalar_select %p31_p2, %s2907_s11, %s33_s22  }
  0x2c   : > { %p42_p8 = por %p41_p4, %p40_p1  ;;  %p3621_p10 = scmp.eq.s32.totalorder %s2999_s13, 1 }
  0x2d   : > { %s302_s14 = sand.u32 1, %s2907_s11   ;;  %s2434_s18 = sshll.u32 %s2911_s12, 8 }
  0x2e   : > { %p3069_p12 = por %p3621_p10, %p40_p1  ;;  %s2358_s21 = sshll.u32 %s302_s14, 4 }
  0x2f   : > { %s3078_s26 = scalar_lea.hbm %s3599_s0, %s2434_s18  ;;  %s306_s19 = scalar_lea.vmem [#allocation2], %s2358_s21 }
  0x30   : > { %s314_s22 = sshll.u32 %s306_s19, 4  ;;  %p3080_p11 = pnand %p2648_p6, %p42_p8  ;;  %s3084_s22 = int_to_ptr.vmem [resolvable:$true] %s314_s22 }
  0x31   : > { %s3086_s24 = scalar_lea.sflag [#allocation3], %s302_s14  ;;  %s2811_s25 = scalar_lea.hbm %s3078_s26, 256 }
  0x32   : > { %p2812_p13 = scmp.ne.s32.totalorder %s3078_s26, %s2811_s25  ;;  %p2813_p0 = pneg %p3080_p11 }
  0x33   : > { %s2816_s27 = scalar_lea.hbm %s3599_s0, 512  ;;  %p2817_p7 = scmp.lt.u32.totalorder %s3078_s26, %s3599_s0 }
  0x34   : > { %p2814_p3 = pnand %p2813_p0, %p2812_p13  ;;  %p2818_p9 = scmp.lt.u32.totalorder %s2816_s27, %s2811_s25 }
  0x35   : > { %p2820_p1 = scmp.lt.u32.totalorder %s2811_s25, %s3078_s26 }
  0x36   : > { %p2815_p5 = pneg %p2814_p3  ;;  %p2819_p2 = por %p2818_p9, %p2817_p7 }
  0x38   : > { %p2821_p4 = por %p2820_p1, %p2819_p2 }
  0x3a   : > { %p2822_p6 = pnand %p2821_p4, %p2815_p5 }
  0x3c   : > { %2825 = shalt.err (!%p2822_p6)
}
  0x3d   : > { %s2826_s14 = scalar_lea.vmem %s3084_s22, 256  ;;  %s2916_s19 = smov [#allocation2]  }
  0x3e   : > { %p2827_p8 = scmp.ne.s32.totalorder %s3084_s22, %s2826_s14  ;;  %s2831_s16 = sshll.u32 %s2916_s19, 4  ;;  %s2832_s16 = int_to_ptr.vmem [resolvable:$false] %s2831_s16 }
  0x3f   : > { %s2833_s21 = scalar_lea.vmem %s2832_s16, 512  ;;  %p2834_p3 = scmp.lt.s32.totalorder %s3084_s22, %s2832_s16 }
  0x40   : > { %p2829_p10 = pnand %p2827_p8, %p2813_p0  ;;  %p2835_p7 = scmp.lt.s32.totalorder %s2833_s21, %s2826_s14 }
  0x42   : > { %p2830_p13 = pneg %p2829_p10  ;;  %p2836_p9 = por %p2835_p7, %p2834_p3 }
  0x44   : > { %p2837_p2 = pnand %p2836_p9, %p2830_p13 }
  0x46   : > { %2840 = shalt.err (!%p2837_p2)
}
  0x47   : > { %s2917_s25 = smov 32   ;;  %s2918_s27 = smov 2  }
  0x48   : > { %2642 = dma.hbm_to_vmem [thread:$0]  (!%p3080_p11), %s3078_s26, 256, %s3084_s22, %s3086_s24, %s2917_s25, %s2917_s25, %s2918_s27  }
  0x49   : > { %p3624_p0 = scmp.ne.s32.totalorder %s3618_s17, 0 }
  0x4a   : > { %s3117_s18 = sand.u32 (!%p3624_p0), 1, %s2903_s10   ;;  %p3625_p5 = scmp.ne.s32.totalorder (!%p3624_p0), %s3615_s15, 0 }
  0x4b   : > { %346 = sbr.rel (%p3624_p0) target bundleno = 2328 (0x918), region = 56  ;;  %s2363_s20 = sshll.u32 (!%p3624_p0), %s3117_s18, 4 }
  0x4c   : > { %s349_s14 = scalar_lea.sflag (!%p3624_p0), [#allocation3], %s3117_s18  ;;  %s3121_s19 = scalar_lea.vmem (!%p3624_p0), [#allocation2], %s2363_s20 }
  0x52   : > { %2886 = dma.done.wait (%p3625_p5), %s349_s14, 256  }
  0x53   : > { %2888 = vsyncadd (%p3625_p5), %s349_s14, 4294967040  ;;  %p3626_p11 = scmp.eq.s32.totalorder %s2999_s13, 0 }
  0x55   : > { %2890 = dma.done.wait (%p3626_p11), [#allocation6], 512   ;;  %p3627_p1 = pmov %p3626_p11 }
  0x56   : > { %s2366_s17 = sshll.u32 %s2999_s13, 2  ;;  %v2700_v0 = vld [vmem:[#allocation5] sm:$0xff]   ;;  %v2701_v1 = vld [vmem:[#allocation5 + $0x8] sm:$0xff]   ;;  %vm538_vm0 = vcmask 261120   ;;  %v2919_v6 = vmov 32   ;;  %v2920_v7 = vmov 0.0   ;;  %v812_v35 = vlaneseq }
  0x57   : > { %2892 = vsyncadd (%p3627_p1), [#allocation6], 4294966784  ;;  %p405_p4 = scmp.lt.s32.totalorder %s2366_s17, 7  ;;  %2506 = vmatprep.subr.bf16.mxu0 %v2700_v0  ;;  %2696 = vset.pattern.permute.xlu1 %v2919_v6  ;;  %s2921_s15 = smov 95   ;;  %v2440_v37 = vld [vmem:[%s3121_s19] sm:$0xff]   ;;  %v2625_v52 = vld [vmem:[%s3121_s19 + $0x8] sm:$0xff]  }
  0x58   : > { %2507 = vmatpush3.bf16.msra.mxu0 %v2700_v0  ;;  %2697 = vset.pattern.permute.xlu0 %v2919_v6  ;;  %v813_v36 = vshrl.u32 %v812_v35, 7  ;;  %v2442_v39 = vunpack.c.1.s8 %v2440_v37  ;;  %v2441_v41 = vunpack.c.0.s8 %v2440_v37  ;;  %v2446_v42 = vunpack.c.3.s8 %v2440_v37  ;;  %s2365_s19 = sshll.u32 %s3117_s18, 6  ;;  %s2438_s22 = sshll.u32 %s2999_s13, 10 }
  0x59   : > { %s3636_s17 = smov (!%p405_p4, %s2366_s17), 7  ;;  %2508 = vmatprep.subr.bf16.mxu0 %v2701_v1  ;;  %2518 = vmatprep.subr.bf16.mxu1 %v2920_v7  ;;  %v2445_v43 = vunpack.c.2.s8 %v2440_v37  ;;  %v2922_v55 = vmov -1e+30   ;;  %v2450_v57 = vunpack.c.1.s8 %v2625_v52  ;;  %v2449_v63 = vunpack.c.0.s8 %v2625_v52  ;;  %s2233_s16 = scalar_lea.sflag [#allocation4], %s3117_s18 }
  0x5a   : > { %s2435_s26 = sshll.u32 %s3636_s17, 3  ;;  %v3183_v40 = vsub.s32 0, %v813_v36  ;;  %v3185_v45 = vcvt.s32.f32 %v2442_v39  ;;  %v3188_v47 = vcvt.s32.f32 %v2441_v41  ;;  %v3190_v48 = vcvt.s32.f32 %v2446_v42  ;;  %s2436_s25 = sshll.u32 %s3636_s17, 4 }
  0x5b   : > { %s409_s24 = scalar_lea.vmem %s3600_s1, %s2435_s26  ;;  %v3192_v49 = vcvt.s32.f32 %v2445_v43  ;;  %vm460_vm9 = vcmask 130048   ;;  %s416_s14 = scalar_lea.vmem %s3601_s2, %s2436_s25 }
  0x5c   : > { %v2702_v2 = vld [vmem:[%s409_s24] sm:$0xff]   ;;  %v2703_v3 = vld [vmem:[%s409_s24 + $0x8] sm:$0xff]   ;;  %v2704_v4 = vld [vmem:[%s409_s24 + $0x10] sm:$0xff]   ;;  %2509 = vmatpush3.bf16.msra.mxu0 %v2701_v1  ;;  %vm445_vm1 = vcmp.gt.f32.partialorder %v3185_v45, 0.0  ;;  %vm444_vm2 = vcmp.gt.f32.partialorder %v3188_v47, 0.0  ;;  %vm447_vm3 = vcmp.gt.f32.partialorder %v3190_v48, 0.0 }
  0x5d   : > { %2510 = vmatprep.mubr.msk.bf16.mxu0 %vm538_vm0, %v2702_v2  ;;  %v2705_v5 = vld [vmem:[%s409_s24 + $0x18] sm:$0xff]   ;;  %2536 = vmatprep.subr.bf16.mxu0 %v2920_v7  ;;  %v3199_v56 = vsel %vm445_vm1, 0.0, %v2922_v55  ;;  %vm446_vm4 = vcmp.gt.f32.partialorder %v3192_v49, 0.0  ;;  %v3204_v62 = vsel %vm444_vm2, 0.0, %v2922_v55  ;;  %v3207_v2 = vsel %vm447_vm3, 0.0, %v2922_v55  ;;  %s402_s26 = scalar_lea.vmem [#allocation7], %s2365_s19 }
  0x5e   : > { %vm2923_vm3 = vmmov 0   ;;  %s2247_s17 = sshll.u32 %s402_s26, 4  ;;  %s2925_s21 = smov [#allocation7]   ;;  %s3550_s17 = int_to_ptr.vmem [resolvable:$true] %s2247_s17 }
  0x5f   : > { %2511 = vmatmul.mubr.msk.bf16.vlgmr.msra.gmra.mrb[0].mxu0 %vm538_vm0, %v2703_v3  ;;  %v3210_v3 = vsel %vm446_vm4, 0.0, %v2922_v55  ;;  %2520 = vmatprep.mubr.msk.bf16.mxu1 %vm2923_vm3, %v2920_v7  ;;  %s2841_s13 = scalar_lea.vmem %s3550_s17, 1024  ;;  %s2845_s25 = sshll.u32 %s2925_s21, 4  ;;  %s2846_s25 = int_to_ptr.vmem [resolvable:$false] %s2845_s25 }
  0x60   : > { %2514 = vmatprep.mubr.msk.bf16.mxu0 %vm538_vm0, %v2704_v4  ;;  %v3212_v4 = vcvt.s32.f32 %v2450_v57  ;;  %p2842_p6 = scmp.ne.s32.totalorder %s3550_s17, %s2841_s13  ;;  %s2847_s27 = scalar_lea.vmem %s2846_s25, 2048 }
  0x61   : > { %p2848_p13 = scmp.lt.s32.totalorder %s3550_s17, %s2846_s25  ;;  %p2849_p3 = scmp.lt.s32.totalorder %s2847_s27, %s2841_s13 }
  0x62   : > { %vm449_vm10 = vcmp.gt.f32.partialorder %v3212_v4, 0.0  ;;  %p2843_p8 = pnand %p2842_p6, %p3069_p12 }
  0x63   : > { %v3246_v39 = vsel %vm449_vm10, 0.0, %v2922_v55  ;;  %p2850_p7 = por %p2849_p3, %p2848_p13 }
  0x64   : > { %p2844_p10 = pneg %p2843_p8 }
  0x66   : > { %p2851_p9 = pnand %p2850_p7, %p2844_p10 }
  0x67   : > { %2515 = vmatmul.mubr.msk.bf16.gmra.mrb[4].mxu0 %vm538_vm0, %v2705_v5 }
  0x68   : > { %2538 = vmatprep.mubr.msk.bf16.mxu0 %vm2923_vm3, %v2920_v7 }
 0x132   : > { %v3144_v8 = vpop.f32.mrb[0].mxu0 }
 0x133   : > { %632 = vrot.lane.b32.xlu1 %v3144_v8, %s2921_s15  ;;  %v585_v9 = vpop.f32.mrb[1].mxu0 }
 0x134   : > { %628 = vrot.lane.b32.xlu0 %v585_v9, %s2921_s15  ;;  %v3149_v10 = vpop.f32.mrb[2].mxu0 }
 0x135   : > { %v617_v11 = vpack.c.bf16 %v3149_v10, %v3144_v8  ;;  %v588_v12 = vpop.f32.mrb[3].mxu0 }
 0x136   : > { %v616_v13 = vpack.c.bf16 %v588_v12, %v585_v9 }
 0x137   : > { %789 = vperm.xlu1 %2696, %v3144_v8  }
 0x138   : > { %781 = vperm.xlu0 %2697, %v585_v9   ;;  %2519 = vmatpush3.bf16.msra.mxu1 %v616_v13 }
 0x139   : > { %2524 = vmatprep.subr.bf16.mxu1 %v2920_v7 }
 0x13a   : > { %v2516_v14 = vpop.f32.mrb[4].mxu0 }
 0x13b   : > { %634 = vrot.lane.b32.xlu1 %v3149_v10, %s2921_s15  ;;  %v3157_v15 = vpop.f32.mrb[5].mxu0 }
 0x13c   : > { %793 = vperm.xlu0 %2697, %v3149_v10   ;;  %v2517_v16 = vpop.f32.mrb[6].mxu0  ;;  %v464_v10 = vsel %vm460_vm9, %v3185_v45, -inf  ;;  %v470_v45 = vsel %vm460_vm9, %v3190_v48, -inf }
 0x13d   : > { %v619_v17 = vpack.c.bf16 %v2517_v16, %v2516_v14  ;;  %v3160_v18 = vpop.f32.mrb[7].mxu0 }
 0x13e   : > { %v618_v19 = vpack.c.bf16 %v3160_v18, %v3157_v15 }
 0x13f   : > { %785 = vperm.xlu1 %2696, %v588_v12   ;;  %2537 = vmatpush3.bf16.msra.mxu0 %v619_v17  ;;  %v2453_v17 = vunpack.c.2.s8 %v2625_v52 }
 0x140   : > { %630 = vrot.lane.b32.xlu0 %v588_v12, %s2921_s15 }
 0x143   : > { %640 = vrot.lane.b32.xlu1 %v2516_v14, %s2921_s15 }
 0x144   : > { %636 = vrot.lane.b32.xlu0 %v3157_v15, %s2921_s15 }
 0x147   : > { %805 = vperm.xlu1 %2696, %v2516_v14  }
 0x148   : > { %809 = vperm.xlu0 %2697, %v2517_v16  }
 0x14b   : > { %797 = vperm.xlu1 %2696, %v3157_v15  }
 0x14c   : > { %638 = vrot.lane.b32.xlu0 %v3160_v18, %s2921_s15 }
 0x14f   : > { %642 = vrot.lane.b32.xlu1 %v2517_v16, %s2921_s15  ;;  %v2454_v16 = vunpack.c.3.s8 %v2625_v52 }
 0x150   : > { %801 = vperm.xlu0 %2697, %v3160_v18  }
 0x1a5   : > { %v633_v20 = vpop.permute.xlu1 %632 }
 0x1a6   : > { %v629_v21 = vpop.permute.xlu0 %628  ;;  %684 = vxpose.xlu0.b32.start [1/2] (short) (narrow) %v633_v20, 8  ;;  %v3220_v20 = vcvt.s32.f32 %v2449_v63 }
 0x1a7   : > { %652 = vxpose.xlu1.b32.start [1/2] (short) (narrow) %v629_v21, 8 }
 0x1a8   : > { %vm448_vm11 = vcmp.gt.f32.partialorder %v3220_v20, 0.0 }
 0x1a9   : > { %v3250_v42 = vsel %vm448_vm11, 0.0, %v2922_v55 }
 0x1b6   : > { %v790_v22 = vpop.permute.xlu1 %789 }
 0x1b7   : > { %v782_v23 = vpop.permute.xlu0 %781 }
 0x1ba   : > { %v635_v24 = vpop.permute.xlu1 %634 }
 0x1bb   : > { %v794_v25 = vpop.permute.xlu0 %793  ;;  %685 = vxpose.xlu0.b32.end [2/2] (short) (narrow) %v635_v24, 8 }
 0x1be   : > { %v786_v26 = vpop.permute.xlu1 %785 }
 0x1bf   : > { %v631_v27 = vpop.permute.xlu0 %630 }
 0x1c0   : > { %653 = vxpose.xlu1.b32.end [2/2] (short) (narrow) %v631_v27, 8  ;;  %v3235_v27 = vcvt.s32.f32 %v2453_v17 }
 0x1c2   : > { %v641_v28 = vpop.permute.xlu1 %640  ;;  %vm450_vm13 = vcmp.gt.f32.partialorder %v3235_v27, 0.0 }
 0x1c3   : > { %v637_v29 = vpop.permute.xlu0 %636  ;;  %v3260_v52 = vsel %vm450_vm13, 0.0, %v2922_v55 }
 0x1c4   : > { %748 = vxpose.xlu1.b32.start [1/2] (short) (narrow) %v641_v28, 8  ;;  %716 = vxpose.xlu0.b32.start [1/2] (short) (narrow) %v637_v29, 8 }
 0x1c6   : > { %v3173_v30 = vpop.permute.xlu1 %805 }
 0x1c7   : > { %v3175_v31 = vpop.permute.xlu0 %809 }
 0x1ca   : > { %v3177_v32 = vpop.permute.xlu1 %797 }
 0x1cb   : > { %v639_v33 = vpop.permute.xlu0 %638 }
 0x1cc   : > { %717 = vxpose.xlu0.b32.end [2/2] (short) (narrow) %v639_v33, 8 }
 0x1ce   : > { %v643_v34 = vpop.permute.xlu1 %642 }
 0x1cf   : > { %749 = vxpose.xlu1.b32.end [2/2] (short) (narrow) %v643_v34, 8  ;;  %v3181_v38 = vpop.permute.xlu0 %801 }
 0x237   : > { %v700_v44 = vpop.trf.xlu0 }
 0x238   : > { %v819_v46 = vrot.slane %v700_v44, %v3183_v40 }
 0x23a   : > { %v830_v50 = vadd.f32 %v819_v46, %v790_v22  ;;  %v831_v51 = vadd.f32 %v819_v46, %v794_v25 }
 0x23c   : > { %v668_v53 = vpop.trf.xlu1  ;;  %v846_v58 = vmul.f32 0.2, %v830_v50  ;;  %v847_v59 = vmul.f32 0.2, %v831_v51  ;;  %vm839_vm5 = vcmp.gt.f32.partialorder %v831_v51, 0.0  ;;  %vm838_vm6 = vcmp.gt.f32.partialorder %v830_v50, 0.0 }
 0x23d   : > { %v815_v54 = vrot.slane %v668_v53, %v3183_v40 }
 0x23e   : > { %v855_v9 = vsel %vm839_vm5, %v831_v51, %v847_v59  ;;  %v854_v12 = vsel %vm838_vm6, %v830_v50, %v846_v58 }
 0x23f   : > { %v828_v60 = vadd.f32 %v815_v54, %v782_v23  ;;  %v829_v61 = vadd.f32 %v815_v54, %v786_v26  ;;  %v3227_v23 = vadd.f32 %v855_v9, %v3207_v2  ;;  %v3230_v24 = vadd.f32 %v854_v12, %v3210_v3 }
 0x240   : > { %v3233_v26 = vcvt.s32.f32 %v2454_v16 }
 0x241   : > { %v844_v0 = vmul.f32 0.2, %v828_v60  ;;  %v845_v1 = vmul.f32 0.2, %v829_v61  ;;  %vm837_vm7 = vcmp.gt.f32.partialorder %v829_v61, 0.0  ;;  %vm836_vm8 = vcmp.gt.f32.partialorder %v828_v60, 0.0 }
 0x242   : > { %v877_v29 = vsel %vm460_vm9, %v3227_v23, -inf  ;;  %v874_v33 = vsel %vm460_vm9, %v3230_v24, -inf  ;;  %vm451_vm12 = vcmp.gt.f32.partialorder %v3233_v26, 0.0 }
 0x243   : > { %v853_v5 = vsel %vm837_vm7, %v829_v61, %v845_v1  ;;  %v852_v6 = vsel %vm836_vm8, %v828_v60, %v844_v0  ;;  %v3257_v51 = vsel %vm451_vm12, 0.0, %v2922_v55 }
 0x244   : > { %v3215_v13 = vadd.f32 %v853_v5, %v3199_v56  ;;  %v3218_v14 = vadd.f32 %v852_v6, %v3204_v62 }
 0x246   : > { %v871_v21 = vsel %vm460_vm9, %v3215_v13, -inf  ;;  %v868_v22 = vsel %vm460_vm9, %v3218_v14, -inf }
 0x247   : > { %872 = vmax.xlane.f32.xlu1 %v871_v21  ;;  %869 = vmax.xlane.f32.xlu0 %v868_v22 }
 0x248   : > { %v732_v25 = vpop.trf.xlu0 }
 0x249   : > { %v823_v28 = vrot.slane %v732_v25, %v3183_v40 }
 0x24b   : > { %v832_v34 = vadd.f32 %v823_v28, %v3177_v32  ;;  %v833_v36 = vadd.f32 %v823_v28, %v3181_v38  ;;  %v764_v37 = vpop.trf.xlu1  ;;  %878 = vmax.xlane.f32.xlu1 %v877_v29  ;;  %875 = vmax.xlane.f32.xlu0 %v874_v33 }
 0x24c   : > { %v827_v41 = vrot.slane %v764_v37, %v3183_v40 }
 0x24d   : > { %v848_v43 = vmul.f32 0.2, %v832_v34  ;;  %v849_v44 = vmul.f32 0.2, %v833_v36  ;;  %vm841_vm14 = vcmp.gt.f32.partialorder %v833_v36, 0.0  ;;  %vm840_vm15 = vcmp.gt.f32.partialorder %v832_v34, 0.0 }
 0x24e   : > { %v834_v32 = vadd.f32 %v827_v41, %v3173_v30  ;;  %v835_v38 = vadd.f32 %v827_v41, %v3175_v31 }
 0x24f   : > { %v857_v46 = vsel %vm841_vm14, %v833_v36, %v849_v44  ;;  %v856_v50 = vsel %vm840_vm15, %v832_v34, %v848_v43 }
 0x250   : > { %v850_v53 = vmul.f32 0.2, %v834_v32  ;;  %v851_v54 = vmul.f32 0.2, %v835_v38  ;;  %v865_v57 = vadd.f32 %v857_v46, %v3246_v39  ;;  %v864_v58 = vadd.f32 %v856_v50, %v3250_v42 }
 0x251   : > { %vm843_vm1 = vcmp.gt.f32.partialorder %v835_v38, 0.0  ;;  %vm842_vm2 = vcmp.gt.f32.partialorder %v834_v32, 0.0 }
 0x252   : > { %v883_v30 = vsel %vm460_vm9, %v865_v57, -inf  ;;  %v880_v31 = vsel %vm460_vm9, %v864_v58, -inf  ;;  %v859_v59 = vsel %vm843_vm1, %v835_v38, %v851_v54  ;;  %v858_v60 = vsel %vm842_vm2, %v834_v32, %v850_v53 }
 0x253   : > { %884 = vmax.xlane.f32.xlu1 %v883_v30  ;;  %881 = vmax.xlane.f32.xlu0 %v880_v31  ;;  %v867_v61 = vadd.f32 %v859_v59, %v3257_v51  ;;  %v866_v55 = vadd.f32 %v858_v60, %v3260_v52 }
 0x255   : > { %v889_v63 = vsel %vm460_vm9, %v867_v61, -inf  ;;  %v886_v0 = vsel %vm460_vm9, %v866_v55, -inf }
 0x257   : > { %890 = vmax.xlane.f32.xlu1 %v889_v63  ;;  %887 = vmax.xlane.f32.xlu0 %v886_v0  ;;  %v476_v0 = vsel %vm460_vm9, %v3212_v4, -inf }
 0x2d4   : > { %v873_v1 = vpop.xlane.xlu1 %872  ;;  %v870_v5 = vpop.xlane.xlu0 %869 }
 0x2d5   : > { %v893_v6 = vsub.f32 %v3215_v13, %v873_v1  ;;  %v892_v9 = vsub.f32 %v3218_v14, %v870_v5  ;;  %v473_v1 = vsel %vm460_vm9, %v3220_v20, -inf  ;;  %v482_v5 = vsel %vm460_vm9, %v3233_v26, -inf }
 0x2d7   : > { %v902_v12 = vmul.f32 1.442695, %v893_v6  ;;  %v900_v16 = vmul.f32 1.442695, %v892_v9  ;;  %v479_v6 = vsel %vm460_vm9, %v3235_v27, -inf  ;;  %v2706_v9 = vld [vmem:[#allocation5 + $0x10] sm:$0xff]  }
 0x2d8   : > { %v879_v17 = vpop.xlane.xlu1 %878  ;;  %v876_v21 = vpop.xlane.xlu0 %875  ;;  %2542 = vmatprep.subr.bf16.mxu0 %v2706_v9 }
 0x2d9   : > { %2719 = vpow2.f32 %v902_v12  ;;  %v895_v22 = vsub.f32 %v3227_v23, %v879_v17  ;;  %v894_v25 = vsub.f32 %v3230_v24, %v876_v21  ;;  %v2707_v12 = vld [vmem:[#allocation5 + $0x18] sm:$0xff]  }
 0x2da   : > { %2721 = vpow2.f32 %v900_v16 }
 0x2db   : > { %v906_v28 = vmul.f32 1.442695, %v895_v22  ;;  %v904_v29 = vmul.f32 1.442695, %v894_v25 }
 0x2dd   : > { %2723 = vpow2.f32 %v906_v28 }
 0x2de   : > { %2725 = vpow2.f32 %v904_v29 }
 0x2e0   : > { %v885_v33 = vpop.xlane.xlu1 %884  ;;  %v882_v34 = vpop.xlane.xlu0 %881 }
 0x2e1   : > { %v897_v36 = vsub.f32 %v865_v57, %v885_v33  ;;  %v896_v13 = vsub.f32 %v864_v58, %v882_v34 }
 0x2e3   : > { %v2720_v37 = vpop.eup %2719  ;;  %v910_v14 = vmul.f32 1.442695, %v897_v36  ;;  %v908_v43 = vmul.f32 1.442695, %v896_v13 }
 0x2e4   : > { %v2722_v41 = vpop.eup %2721  ;;  %v891_v44 = vpop.xlane.xlu1 %890  ;;  %v919_v30 = vsel %vm460_vm9, %v2720_v37, 0.0 }
 0x2e5   : > { %v888_v32 = vpop.xlane.xlu0 %887  ;;  %v899_v38 = vsub.f32 %v867_v61, %v891_v44  ;;  %v940_v23 = vpack.c.bf16 %v2720_v37, %v2722_v41  ;;  %2727 = vpow2.f32 %v910_v14  ;;  %v916_v31 = vsel %vm460_vm9, %v2722_v41, 0.0 }
 0x2e6   : > { %v898_v46 = vsub.f32 %v866_v55, %v888_v32  ;;  %2729 = vpow2.f32 %v908_v43 }
 0x2e7   : > { %v2724_v50 = vpop.eup %2723  ;;  %v914_v24 = vmul.f32 1.442695, %v899_v38  ;;  %2521 = vmatmul.mubr.msk.bf16.vlgmr.msra.gmra.mrb[0].mxu1 %vm460_vm9, %v940_v23  ;;  %v3334_v38 = vld [vmem:[%s3603_s4] ss:$0 sm:$0xff] }
 0x2e8   : > { %v912_v53 = vmul.f32 1.442695, %v898_v46  ;;  %v2726_v54 = vpop.eup %2725  ;;  %2525 = vmatpush3.bf16.msra.mxu1 %v617_v11  ;;  %v925_v57 = vsel %vm460_vm9, %v2724_v50, 0.0  ;;  %2526 = vmatprep.mubr.msk.bf16.mxu1 %vm2923_vm3, %v2920_v7  ;;  %v461_v11 = vsel %vm460_vm9, %v3188_v47, -inf  ;;  %v467_v47 = vsel %vm460_vm9, %v3192_v49, -inf }
 0x2e9   : > { %2731 = vpow2.f32 %v914_v24  ;;  %926 = vadd.xlane.f32.xlu1 %v925_v57  ;;  %v922_v58 = vsel %vm460_vm9, %v2726_v54, 0.0  ;;  %2530 = vmatprep.subr.bf16.mxu1 %v2920_v7  ;;  %v941_v8 = vpack.c.bf16 %v2724_v50, %v2726_v54 }
 0x2ea   : > { %2733 = vpow2.f32 %v912_v53  ;;  %923 = vadd.xlane.f32.xlu0 %v922_v58 }
 0x2ed   : > { %920 = vadd.xlane.f32.xlu1 %v919_v30 }
 0x2ee   : > { %917 = vadd.xlane.f32.xlu0 %v916_v31 }
 0x2ef   : > { %2527 = vmatmul.mubr.msk.bf16.vlgmr.msra.gmra.mrb[4].mxu1 %vm460_vm9, %v941_v8  ;;  %v2728_v59 = vpop.eup %2727 }
 0x2f0   : > { %2531 = vmatpush3.bf16.msra.mxu1 %v618_v19  ;;  %2532 = vmatprep.mubr.msk.bf16.mxu1 %vm2923_vm3, %v2920_v7  ;;  %v2730_v60 = vpop.eup %2729  ;;  %v931_v18 = vsel %vm460_vm9, %v2728_v59, 0.0 }
 0x2f1   : > { %465 = vmax.xlane.f32.xlu1 %v464_v10  ;;  %2566 = vmatprep.subr.bf16.mxu1 %v2920_v7  ;;  %v942_v15 = vpack.c.bf16 %v2728_v59, %v2730_v60  ;;  %v928_v19 = vsel %vm460_vm9, %v2730_v60, 0.0 }
 0x2f2   : > { %462 = vmax.xlane.f32.xlu0 %v461_v11 }
 0x2f3   : > { %v2732_v61 = vpop.eup %2731 }
 0x2f4   : > { %v2734_v55 = vpop.eup %2733  ;;  %v937_v48 = vsel %vm460_vm9, %v2732_v61, 0.0 }
 0x2f5   : > { %v943_v63 = vpack.c.bf16 %v2732_v61, %v2734_v55  ;;  %471 = vmax.xlane.f32.xlu1 %v470_v45  ;;  %v934_v49 = vsel %vm460_vm9, %v2734_v55, 0.0 }
 0x2f6   : > { %468 = vmax.xlane.f32.xlu0 %v467_v47 }
 0x2f7   : > { %2533 = vmatmul.mubr.msk.bf16.vlgmr.msra.gmra.mrb[8].mxu1 %vm460_vm9, %v942_v15  ;;  %2539 = vmatmul.mubr.msk.bf16.vlgmr.msra.gmra.mrb[8].mxu0 %vm460_vm9, %v943_v63 }
 0x2f8   : > { %2568 = vmatprep.mubr.msk.bf16.mxu1 %vm2923_vm3, %v2920_v7  ;;  %2543 = vmatpush3.bf16.msra.mxu0 %v2706_v9 }
 0x2f9   : > { %932 = vadd.xlane.f32.xlu1 %v931_v18  ;;  %2544 = vmatprep.subr.bf16.mxu0 %v2707_v12 }
 0x2fa   : > { %929 = vadd.xlane.f32.xlu0 %v928_v19 }
 0x2fc   : > { %2545 = vmatpush3.bf16.msra.mxu0 %v2707_v12 }
 0x2fd   : > { %938 = vadd.xlane.f32.xlu1 %v937_v48  ;;  %2554 = vmatprep.subr.bf16.mxu0 %v2920_v7 }
 0x2fe   : > { %935 = vadd.xlane.f32.xlu0 %v934_v49 }
 0x301   : > { %477 = vmax.xlane.f32.xlu1 %v476_v0 }
 0x302   : > { %474 = vmax.xlane.f32.xlu0 %v473_v1 }
 0x305   : > { %483 = vmax.xlane.f32.xlu1 %v482_v5 }
 0x306   : > { %480 = vmax.xlane.f32.xlu0 %v479_v6 }
 0x376   : > { %v927_v20 = vpop.xlane.xlu1 %926 }
 0x377   : > { %v924_v4 = vpop.xlane.xlu0 %923  ;;  %v1123_v36 = vmax.f32 %v927_v20, 1e-20 }
 0x378   : > { %v1122_v33 = vmax.f32 %v924_v4, 1e-20 }
 0x37a   : > { %v921_v17 = vpop.xlane.xlu1 %920 }
 0x37b   : > { %v918_v16 = vpop.xlane.xlu0 %917  ;;  %v1121_v25 = vmax.f32 %v921_v17, 1e-20 }
 0x37c   : > { %v1120_v22 = vmax.f32 %v918_v16, 1e-20 }
 0x37e   : > { %v3323_v26 = vpop.xlane.xlu1 %465  ;;  %2735 = vrcp.f32 %v1120_v22 }
 0x37f   : > { %v3321_v21 = vpop.xlane.xlu0 %462  ;;  %2737 = vrcp.f32 %v1121_v25  ;;  %vm486_vm5 = vcmp.gt.f32.partialorder %v3323_v26, 0.0 }
 0x380   : > { %2739 = vrcp.f32 %v1122_v33  ;;  %vm485_vm4 = vcmp.gt.f32.partialorder %v3321_v21, 0.0 }
 0x381   : > { %2741 = vrcp.f32 %v1123_v36 }
 0x382   : > { %v3327_v28 = vpop.xlane.xlu1 %471 }
 0x383   : > { %v3325_v27 = vpop.xlane.xlu0 %468  ;;  %vm488_vm7 = vcmp.gt.f32.partialorder %v3327_v28, 0.0 }
 0x384   : > { %vm487_vm6 = vcmp.gt.f32.partialorder %v3325_v27, 0.0 }
 0x386   : > { %v933_v34 = vpop.xlane.xlu1 %932 }
 0x387   : > { %v930_v29 = vpop.xlane.xlu0 %929  ;;  %v1125_v32 = vmax.f32 %v933_v34, 1e-20 }
 0x388   : > { %v2736_v37 = vpop.eup %2735  ;;  %v1124_v14 = vmax.f32 %v930_v29, 1e-20 }
 0x389   : > { %v2738_v43 = vpop.eup %2737  ;;  %v1136_v23 = vsel %vm485_vm4, %v2736_v37, 0.0 }
 0x38a   : > { %v939_v41 = vpop.xlane.xlu1 %938  ;;  %2743 = vrcp.f32 %v1124_v14  ;;  %v1137_v57 = vsel %vm486_vm5, %v2738_v43, 0.0  ;;  %v2740_v10 = vpop.eup %2739 }
 0x38b   : > { %v936_v13 = vpop.xlane.xlu0 %935  ;;  %v1127_v50 = vmax.f32 %v939_v41, 1e-20  ;;  %v2742_v60 = vpop.eup %2741  ;;  %v1138_v55 = vsel %vm487_vm6, %v2740_v10, 0.0 }
 0x38c   : > { %v1126_v44 = vmax.f32 %v936_v13, 1e-20  ;;  %v1139_v49 = vsel %vm488_vm7, %v2742_v60, 0.0 }
 0x38e   : > { %2745 = vrcp.f32 %v1126_v44  ;;  %v3345_v59 = vpop.xlane.xlu1 %477 }
 0x38f   : > { %2747 = vrcp.f32 %v1125_v32  ;;  %v3341_v8 = vpop.xlane.xlu0 %474  ;;  %vm490_vm11 = vcmp.gt.f32.partialorder %v3345_v59, 0.0  ;;  %v2712_v59 = vld [vmem:[%s3607_s8 + $0x8] sm:$0xff]  }
 0x390   : > { %2749 = vrcp.f32 %v1127_v50  ;;  %vm489_vm8 = vcmp.gt.f32.partialorder %v3341_v8, 0.0 }
 0x392   : > { %v3356_v9 = vpop.xlane.xlu1 %483 }
 0x393   : > { %v3350_v19 = vpop.xlane.xlu0 %480  ;;  %vm492_vm12 = vcmp.gt.f32.partialorder %v3356_v9, 0.0 }
 0x394   : > { %v2744_v6 = vpop.eup %2743  ;;  %vm491_vm10 = vcmp.gt.f32.partialorder %v3350_v19, 0.0 }
 0x395   : > { %v1140_v29 = vsel %vm489_vm8, %v2744_v6, 0.0 }
 0x398   : > { %v2746_v12 = vpop.eup %2745 }
 0x399   : > { %v2748_v20 = vpop.eup %2747  ;;  %v1142_v34 = vsel %vm491_vm10, %v2746_v12, 0.0 }
 0x39a   : > { %v2750_v16 = vpop.eup %2749  ;;  %v1141_v44 = vsel %vm490_vm11, %v2748_v20, 0.0 }
 0x3ba   : > { %v981_v46 = vpop.f32.mrb[0].mxu1 }
 0x3bb   : > { %v1144_v24 = vmul.f32 %v1136_v23, %v981_v46  ;;  %v2522_v53 = vpop.f32.mrb[1].mxu1  ;;  %v1143_v46 = vsel %vm492_vm12, %v2750_v16, 0.0 }
 0x3bc   : > { %v984_v54 = vpop.f32.mrb[2].mxu1 }
 0x3bd   : > { %v1158_v58 = vadd.f32 %v3334_v38, %v1144_v24  ;;  %v1145_v30 = vmul.f32 %v1137_v57, %v984_v54  ;;  %v2523_v31 = vpop.f32.mrb[3].mxu1 }
 0x3bf   : > { %v1159_v11 = vadd.f32 %v3334_v38, %v1145_v30  ;;  %v1166_v45 = vmax.f32 %v1158_v58, 0.0 }
 0x3c1   : > { %v1167_v61 = vmax.f32 %v1159_v11, 0.0 }
 0x3c2   : > { %v1025_v47 = vpop.f32.mrb[4].mxu1 }
 0x3c3   : > { %v1181_v63 = vpack.c.bf16 %v1167_v61, %v1166_v45  ;;  %v1146_v15 = vmul.f32 %v1138_v55, %v1025_v47  ;;  %v2528_v18 = vpop.f32.mrb[5].mxu1 }
 0x3c4   : > { %v1028_v48 = vpop.f32.mrb[6].mxu1 }
 0x3c5   : > { %v1160_v0 = vadd.f32 %v3334_v38, %v1146_v15  ;;  %v1147_v1 = vmul.f32 %v1139_v49, %v1028_v48  ;;  %v2529_v5 = vpop.f32.mrb[7].mxu1  ;;  %2546 = vmatprep.mubr.msk.bf16.mxu0 %vm538_vm0, %v1181_v63 }
 0x3c7   : > { %v1161_v4 = vadd.f32 %v3334_v38, %v1147_v1  ;;  %v1168_v17 = vmax.f32 %v1160_v0, 0.0 }
 0x3c9   : > { %v1169_v22 = vmax.f32 %v1161_v4, 0.0 }
 0x3ca   : > { %v1069_v25 = vpop.f32.mrb[8].mxu1  ;;  %v1113_v33 = vpop.f32.mrb[8].mxu0 }
 0x3cb   : > { %v1182_v36 = vpack.c.bf16 %v1169_v22, %v1168_v17  ;;  %v1148_v13 = vmul.f32 %v1140_v29, %v1069_v25  ;;  %v1150_v37 = vmul.f32 %v1142_v34, %v1113_v33  ;;  %v2534_v14 = vpop.f32.mrb[9].mxu1  ;;  %v2540_v41 = vpop.f32.mrb[9].mxu0 }
 0x3cc   : > { %v1072_v43 = vpop.f32.mrb[10].mxu1  ;;  %v1116_v32 = vpop.f32.mrb[10].mxu0 }
 0x3cd   : > { %v1162_v23 = vadd.f32 %v3334_v38, %v1148_v13  ;;  %v1164_v50 = vadd.f32 %v3334_v38, %v1150_v37  ;;  %v1149_v24 = vmul.f32 %v1141_v44, %v1072_v43  ;;  %v1151_v53 = vmul.f32 %v1143_v46, %v1116_v32  ;;  %v2535_v54 = vpop.f32.mrb[11].mxu1  ;;  %v2541_v57 = vpop.f32.mrb[11].mxu0  ;;  %2547 = vmatmul.mubr.msk.bf16.vlgmr.msra.gmra.mrb[12].mxu0 %vm538_vm0, %v1182_v36 }
 0x3cf   : > { %v1163_v58 = vadd.f32 %v3334_v38, %v1149_v24  ;;  %v1165_v30 = vadd.f32 %v3334_v38, %v1151_v53  ;;  %v1170_v31 = vmax.f32 %v1162_v23, 0.0  ;;  %v1172_v10 = vmax.f32 %v1164_v50, 0.0 }
 0x3d1   : > { %v1171_v11 = vmax.f32 %v1163_v58, 0.0  ;;  %v1173_v60 = vmax.f32 %v1165_v30, 0.0 }
 0x3d3   : > { %v1183_v45 = vpack.c.bf16 %v1171_v11, %v1170_v31  ;;  %v1184_v61 = vpack.c.bf16 %v1173_v60, %v1172_v10 }
 0x3d5   : > { %2550 = vmatprep.mubr.msk.bf16.mxu0 %vm538_vm0, %v1183_v45 }
 0x3d6   : > { %2551 = vmatmul.mubr.msk.bf16.gmra.mrb[16].mxu0 %vm538_vm0, %v1184_v61 }
 0x3d7   : > { %2556 = vmatprep.mubr.msk.bf16.mxu0 %vm2923_vm3, %v2920_v7 }
 0x4a0   : > { %v3380_v47 = vpop.f32.mrb[12].mxu0 }
 0x4a1   : > { %1290 = vrot.lane.b32.xlu1 %v3380_v47, %s2921_s15  ;;  %v1243_v55 = vpop.f32.mrb[13].mxu0 }
 0x4a2   : > { %1286 = vrot.lane.b32.xlu0 %v1243_v55, %s2921_s15  ;;  %v3385_v38 = vpop.f32.mrb[14].mxu0 }
 0x4a3   : > { %v1275_v63 = vpack.c.bf16 %v3385_v38, %v3380_v47  ;;  %v1246_v15 = vpop.f32.mrb[15].mxu0 }
 0x4a4   : > { %v1274_v18 = vpack.c.bf16 %v1246_v15, %v1243_v55 }
 0x4a5   : > { %1447 = vperm.xlu1 %2696, %v3380_v47  }
 0x4a6   : > { %1292 = vrot.lane.b32.xlu0 %v3385_v38, %s2921_s15  ;;  %2555 = vmatpush3.bf16.msra.mxu0 %v1274_v18 }
 0x4a7   : > { %2560 = vmatprep.subr.bf16.mxu0 %v2920_v7 }
 0x4a9   : > { %1439 = vperm.xlu1 %2696, %v1243_v55   ;;  %v3393_v48 = vpop.f32.mrb[16].mxu0 }
 0x4aa   : > { %1451 = vperm.xlu0 %2697, %v3385_v38   ;;  %v1259_v49 = vpop.f32.mrb[17].mxu0 }
 0x4ab   : > { %v3396_v0 = vpop.f32.mrb[18].mxu0 }
 0x4ac   : > { %v1277_v1 = vpack.c.bf16 %v3396_v0, %v3393_v48  ;;  %v1262_v5 = vpop.f32.mrb[19].mxu0 }
 0x4ad   : > { %v1276_v6 = vpack.c.bf16 %v1262_v5, %v1259_v49  ;;  %1288 = vrot.lane.b32.xlu1 %v1246_v15, %s2921_s15 }
 0x4ae   : > { %1443 = vperm.xlu0 %2697, %v1246_v15  }
 0x4af   : > { %2567 = vmatpush3.bf16.msra.mxu1 %v1276_v6 }
 0x4b1   : > { %1463 = vperm.xlu1 %2696, %v3393_v48  }
 0x4b2   : > { %1298 = vrot.lane.b32.xlu0 %v3393_v48, %s2921_s15 }
 0x4b5   : > { %1294 = vrot.lane.b32.xlu1 %v1259_v49, %s2921_s15 }
 0x4b6   : > { %1300 = vrot.lane.b32.xlu0 %v3396_v0, %s2921_s15 }
 0x4b9   : > { %1455 = vperm.xlu1 %2696, %v1259_v49  }
 0x4ba   : > { %1467 = vperm.xlu0 %2697, %v3396_v0   ;;  %v1937_v0 = vld [vmem:[%s416_s14 + $0x8] sm:$0xff] }
 0x4bd   : > { %1296 = vrot.lane.b32.xlu1 %v1262_v5, %s2921_s15  ;;  %s3555_s15 = scalar_lea.hbm %s3608_s9, %s2438_s22 }
 0x4be   : > { %1459 = vperm.xlu0 %2697, %v1262_v5  }
 0x513   : > { %v1291_v12 = vpop.permute.xlu1 %1290 }
 0x514   : > { %1342 = vxpose.xlu0.b32.start [1/2] (short) (narrow) %v1291_v12, 8  ;;  %v1287_v4 = vpop.permute.xlu0 %1286 }
 0x515   : > { %1310 = vxpose.xlu1.b32.start [1/2] (short) (narrow) %v1287_v4, 8 }
 0x518   : > { %v1293_v20 = vpop.permute.xlu0 %1292 }
 0x519   : > { %1343 = vxpose.xlu0.b32.end [2/2] (short) (narrow) %v1293_v20, 8 }
 0x524   : > { %v1448_v16 = vpop.permute.xlu1 %1447 }
 0x528   : > { %v1440_v17 = vpop.permute.xlu1 %1439 }
 0x529   : > { %v1452_v22 = vpop.permute.xlu0 %1451 }
 0x52c   : > { %v1289_v25 = vpop.permute.xlu1 %1288 }
 0x52d   : > { %1311 = vxpose.xlu1.b32.end [2/2] (short) (narrow) %v1289_v25, 8  ;;  %v1444_v29 = vpop.permute.xlu0 %1443 }
 0x530   : > { %v1464_v33 = vpop.permute.xlu1 %1463 }
 0x531   : > { %v1299_v34 = vpop.permute.xlu0 %1298 }
 0x532   : > { %1406 = vxpose.xlu1.b32.start [1/2] (short) (narrow) %v1299_v34, 8 }
 0x534   : > { %v1295_v36 = vpop.permute.xlu1 %1294 }
 0x535   : > { %1374 = vxpose.xlu0.b32.start [1/2] (short) (narrow) %v1295_v36, 8  ;;  %v1301_v13 = vpop.permute.xlu0 %1300 }
 0x536   : > { %1407 = vxpose.xlu1.b32.end [2/2] (short) (narrow) %v1301_v13, 8 }
 0x538   : > { %v1456_v37 = vpop.permute.xlu1 %1455 }
 0x539   : > { %v1468_v41 = vpop.permute.xlu0 %1467 }
 0x53c   : > { %v1297_v14 = vpop.permute.xlu1 %1296 }
 0x53d   : > { %1375 = vxpose.xlu0.b32.end [2/2] (short) (narrow) %v1297_v14, 8  ;;  %v1460_v43 = vpop.permute.xlu0 %1459 }
 0x595   : > { %v1358_v44 = vpop.trf.xlu0 }
 0x596   : > { %v1477_v32 = vrot.slane %v1358_v44, %v3183_v40 }
 0x598   : > { %v1488_v46 = vadd.f32 %v1477_v32, %v1448_v16  ;;  %v1489_v23 = vadd.f32 %v1477_v32, %v1452_v22 }
 0x59a   : > { %v1504_v53 = vmul.f32 0.2, %v1488_v46  ;;  %v1505_v54 = vmul.f32 0.2, %v1489_v23  ;;  %vm1497_vm13 = vcmp.gt.f32.partialorder %v1489_v23, 0.0  ;;  %vm1496_vm14 = vcmp.gt.f32.partialorder %v1488_v46, 0.0 }
 0x59c   : > { %v1513_v60 = vsel %vm1497_vm13, %v1489_v23, %v1505_v54  ;;  %v1512_v45 = vsel %vm1496_vm14, %v1488_v46, %v1504_v53 }
 0x59d   : > { %v1521_v5 = vadd.f32 %v1513_v60, %v3207_v2  ;;  %v1520_v6 = vadd.f32 %v1512_v45, %v3210_v3 }
 0x59f   : > { %v1535_v4 = vsel %vm460_vm9, %v1521_v5, -inf  ;;  %v1532_v20 = vsel %vm460_vm9, %v1520_v6, -inf }
 0x5a9   : > { %v1326_v50 = vpop.trf.xlu1 }
 0x5aa   : > { %v1473_v24 = vrot.slane %v1326_v50, %v3183_v40  ;;  %v2924_v50 = vmov 0  }
 0x5ab   : > { %2699 = vset.pattern.permute.xlu1 %v2924_v50  ;;  %2698 = vset.pattern.permute.xlu0 %v2924_v50  ;;  %v2710_v50 = vld [vmem:[%s3604_s5 + $0x8] sm:$0xff]  }
 0x5ac   : > { %v1486_v57 = vadd.f32 %v1473_v24, %v1440_v17  ;;  %v1487_v58 = vadd.f32 %v1473_v24, %v1444_v29 }
 0x5ae   : > { %v1502_v30 = vmul.f32 0.2, %v1486_v57  ;;  %v1503_v31 = vmul.f32 0.2, %v1487_v58  ;;  %vm1494_vm15 = vcmp.gt.f32.partialorder %v1486_v57, 0.0  ;;  %vm1495_vm1 = vcmp.gt.f32.partialorder %v1487_v58, 0.0 }
 0x5b0   : > { %v1510_v10 = vsel %vm1494_vm15, %v1486_v57, %v1502_v30  ;;  %v1511_v11 = vsel %vm1495_vm1, %v1487_v58, %v1503_v31 }
 0x5b1   : > { %v1518_v61 = vadd.f32 %v1510_v10, %v3204_v62  ;;  %v1519_v55 = vadd.f32 %v1511_v11, %v3199_v56 }
 0x5b2   : > { %v1422_v15 = vpop.trf.xlu1 }
 0x5b3   : > { %v1526_v18 = vsel %vm460_vm9, %v1518_v61, -inf  ;;  %v1529_v49 = vsel %vm460_vm9, %v1519_v55, -inf  ;;  %v1485_v12 = vrot.slane %v1422_v15, %v3183_v40 }
 0x5b4   : > { %1527 = vmax.xlane.f32.xlu0 %v1526_v18  ;;  %1530 = vmax.xlane.f32.xlu1 %v1529_v49 }
 0x5b5   : > { %v1492_v62 = vadd.f32 %v1485_v12, %v1464_v33  ;;  %v1493_v16 = vadd.f32 %v1485_v12, %v1468_v41 }
 0x5b7   : > { %v1508_v22 = vmul.f32 0.2, %v1492_v62  ;;  %v1509_v25 = vmul.f32 0.2, %v1493_v16  ;;  %vm1501_vm2 = vcmp.gt.f32.partialorder %v1493_v16, 0.0  ;;  %vm1500_vm13 = vcmp.gt.f32.partialorder %v1492_v62, 0.0 }
 0x5b8   : > { %1536 = vmax.xlane.f32.xlu1 %v1535_v4  ;;  %1533 = vmax.xlane.f32.xlu0 %v1532_v20 }
 0x5b9   : > { %v1390_v56 = vpop.trf.xlu0  ;;  %v1517_v14 = vsel %vm1501_vm2, %v1493_v16, %v1509_v25  ;;  %v1516_v33 = vsel %vm1500_vm13, %v1492_v62, %v1508_v22 }
 0x5ba   : > { %v1481_v17 = vrot.slane %v1390_v56, %v3183_v40 }
 0x5bc   : > { %v1490_v2 = vadd.f32 %v1481_v17, %v1456_v37  ;;  %v1491_v29 = vadd.f32 %v1481_v17, %v1460_v43  ;;  %v1525_v37 = vadd.f32 %v1517_v14, %v3257_v51  ;;  %v1524_v43 = vadd.f32 %v1516_v33, %v3260_v52 }
 0x5be   : > { %v1506_v3 = vmul.f32 0.2, %v1490_v2  ;;  %v1507_v34 = vmul.f32 0.2, %v1491_v29  ;;  %vm1499_vm14 = vcmp.gt.f32.partialorder %v1491_v29, 0.0  ;;  %vm1498_vm15 = vcmp.gt.f32.partialorder %v1490_v2, 0.0 }
 0x5bf   : > { %v1547_v46 = vsel %vm460_vm9, %v1525_v37, -inf  ;;  %v1544_v23 = vsel %vm460_vm9, %v1524_v43, -inf }
 0x5c0   : > { %v1515_v36 = vsel %vm1499_vm14, %v1491_v29, %v1507_v34  ;;  %v1514_v13 = vsel %vm1498_vm15, %v1490_v2, %v1506_v3 }
 0x5c1   : > { %v1523_v41 = vadd.f32 %v1515_v36, %v3246_v39  ;;  %v1522_v44 = vadd.f32 %v1514_v13, %v3250_v42 }
 0x5c3   : > { %v1541_v40 = vsel %vm460_vm9, %v1523_v41, -inf  ;;  %v1538_v32 = vsel %vm460_vm9, %v1522_v44, -inf }
 0x5c4   : > { %1542 = vmax.xlane.f32.xlu1 %v1541_v40  ;;  %1539 = vmax.xlane.f32.xlu0 %v1538_v32  ;;  %v1940_v40 = vld [vmem:[%s416_s14 + $0x20] sm:$0xff] }
 0x5c5   : > { %v2708_v32 = vld [vmem:[%s3606_s7] sm:$0xff]  }
 0x5c8   : > { %1548 = vmax.xlane.f32.xlu1 %v1547_v46  ;;  %1545 = vmax.xlane.f32.xlu0 %v1544_v23  ;;  %v2709_v23 = vld [vmem:[%s3604_s5] sm:$0xff]  }
 0x5c9   : > { %2578 = vmatprep.subr.bf16.mxu1 %v2709_v23 }
 0x641   : > { %v1531_v39 = vpop.xlane.xlu1 %1530  ;;  %v1528_v42 = vpop.xlane.xlu0 %1527 }
 0x642   : > { %v1551_v24 = vsub.f32 %v1519_v55, %v1531_v39  ;;  %v1550_v53 = vsub.f32 %v1518_v61, %v1528_v42  ;;  %v1943_v39 = vld [vmem:[%s416_s14 + $0x38] sm:$0xff] }
 0x644   : > { %v1560_v54 = vmul.f32 1.442695, %v1551_v24  ;;  %v1558_v57 = vmul.f32 1.442695, %v1550_v53 }
 0x645   : > { %v1537_v51 = vpop.xlane.xlu1 %1536  ;;  %v1534_v58 = vpop.xlane.xlu0 %1533 }
 0x646   : > { %2751 = vpow2.f32 %v1560_v54  ;;  %v1553_v52 = vsub.f32 %v1521_v5, %v1537_v51  ;;  %v1552_v30 = vsub.f32 %v1520_v6, %v1534_v58 }
 0x647   : > { %2753 = vpow2.f32 %v1558_v57 }
 0x648   : > { %v1564_v31 = vmul.f32 1.442695, %v1553_v52  ;;  %v1562_v10 = vmul.f32 1.442695, %v1552_v30  ;;  %v3466_v52 = vand.u32 127, %v812_v35 }
 0x64a   : > { %2755 = vpow2.f32 %v1564_v31 }
 0x64b   : > { %2757 = vpow2.f32 %v1562_v10 }
 0x650   : > { %v2752_v11 = vpop.eup %2751 }
 0x651   : > { %v2754_v60 = vpop.eup %2753  ;;  %v1543_v45 = vpop.xlane.xlu1 %1542  ;;  %v1577_v38 = vsel %vm460_vm9, %v2752_v11, 0.0 }
 0x652   : > { %v1540_v15 = vpop.xlane.xlu0 %1539  ;;  %v1598_v18 = vpack.c.bf16 %v2752_v11, %v2754_v60  ;;  %v1555_v49 = vsub.f32 %v1523_v41, %v1543_v45  ;;  %v1939_v41 = vld [vmem:[%s416_s14 + $0x18] sm:$0xff] }
 0x653   : > { %v1554_v55 = vsub.f32 %v1522_v44, %v1540_v15  ;;  %v1936_v44 = vld [vmem:[%s416_s14] sm:$0xff] }
 0x654   : > { %v2756_v61 = vpop.eup %2755  ;;  %v1568_v12 = vmul.f32 1.442695, %v1555_v49  ;;  %2557 = vmatmul.mubr.msk.bf16.vlgmr.msra.gmra.mrb[20].mxu0 %vm460_vm9, %v1598_v18 }
 0x655   : > { %v1566_v4 = vmul.f32 1.442695, %v1554_v55  ;;  %v2758_v20 = vpop.eup %2757  ;;  %2561 = vmatpush3.bf16.msra.mxu0 %v1275_v63  ;;  %v1549_v5 = vpop.xlane.xlu1 %1548  ;;  %v1583_v62 = vsel %vm460_vm9, %v2756_v61, 0.0  ;;  %2562 = vmatprep.mubr.msk.bf16.mxu0 %vm2923_vm3, %v2920_v7  ;;  %v1574_v63 = vsel %vm460_vm9, %v2754_v60, 0.0 }
 0x656   : > { %v1546_v6 = vpop.xlane.xlu0 %1545  ;;  %2759 = vpow2.f32 %v1568_v12  ;;  %v1557_v16 = vsub.f32 %v1525_v37, %v1549_v5  ;;  %1584 = vadd.xlane.f32.xlu1 %v1583_v62  ;;  %v1580_v17 = vsel %vm460_vm9, %v2758_v20, 0.0  ;;  %2572 = vmatprep.subr.bf16.mxu0 %v2920_v7  ;;  %v1599_v25 = vpack.c.bf16 %v2756_v61, %v2758_v20  ;;  %v1941_v37 = vld [vmem:[%s416_s14 + $0x28] sm:$0xff] }
 0x657   : > { %v1556_v56 = vsub.f32 %v1524_v43, %v1546_v6  ;;  %2761 = vpow2.f32 %v1566_v4  ;;  %1581 = vadd.xlane.f32.xlu0 %v1580_v17  ;;  %v1942_v43 = vld [vmem:[%s416_s14 + $0x30] sm:$0xff] }
 0x658   : > { %v1572_v22 = vmul.f32 1.442695, %v1557_v16 }
 0x659   : > { %v1570_v47 = vmul.f32 1.442695, %v1556_v56 }
 0x65a   : > { %2763 = vpow2.f32 %v1572_v22  ;;  %1578 = vadd.xlane.f32.xlu1 %v1577_v38 }
 0x65b   : > { %2765 = vpow2.f32 %v1570_v47  ;;  %1575 = vadd.xlane.f32.xlu0 %v1574_v63  ;;  %v3486_v47 = vld [vmem:[%s3603_s4 + $0x1] ss:$0 sm:$0xff] }
 0x65c   : > { %2563 = vmatmul.mubr.msk.bf16.vlgmr.msra.gmra.mrb[24].mxu0 %vm460_vm9, %v1599_v25 }
 0x65d   : > { %2573 = vmatpush3.bf16.msra.mxu0 %v1277_v1  ;;  %2574 = vmatprep.mubr.msk.bf16.mxu0 %vm2923_vm3, %v2920_v7  ;;  %v1938_v1 = vld [vmem:[%s416_s14 + $0x10] sm:$0xff] }
 0x65e   : > { %2590 = vmatprep.subr.bf16.mxu0 %v2708_v32 }
 0x660   : > { %v2760_v2 = vpop.eup %2759 }
 0x661   : > { %v2762_v29 = vpop.eup %2761  ;;  %v1589_v46 = vsel %vm460_vm9, %v2760_v2, 0.0 }
 0x662   : > { %v1600_v3 = vpack.c.bf16 %v2760_v2, %v2762_v29  ;;  %v1586_v48 = vsel %vm460_vm9, %v2762_v29, 0.0 }
 0x664   : > { %v2764_v34 = vpop.eup %2763  ;;  %2569 = vmatmul.mubr.msk.bf16.vlgmr.msra.gmra.mrb[12].mxu1 %vm460_vm9, %v1600_v3 }
 0x665   : > { %v2766_v36 = vpop.eup %2765  ;;  %v1595_v13 = vsel %vm460_vm9, %v2764_v34, 0.0  ;;  %2579 = vmatpush3.bf16.msra.mxu1 %v2709_v23 }
 0x666   : > { %1596 = vadd.xlane.f32.xlu1 %v1595_v13  ;;  %v1592_v14 = vsel %vm460_vm9, %v2766_v36, 0.0  ;;  %v1601_v33 = vpack.c.bf16 %v2764_v34, %v2766_v36  ;;  %2580 = vmatprep.subr.bf16.mxu1 %v2710_v50 }
 0x667   : > { %1593 = vadd.xlane.f32.xlu0 %v1592_v14 }
 0x668   : > { %2575 = vmatmul.mubr.msk.bf16.vlgmr.msra.gmra.mrb[28].mxu0 %vm460_vm9, %v1601_v33 }
 0x669   : > { %2591 = vmatpush3.bf16.msra.mxu0 %v2708_v32  ;;  %2581 = vmatpush3.bf16.msra.mxu1 %v2710_v50 }
 0x66b   : > { %1587 = vadd.xlane.f32.xlu0 %v1586_v48 }
 0x677   : > { %1950 = vperm.xlu1 %2699, %v1937_v0  }
 0x67b   : > { %1953 = vperm.xlu1 %2699, %v1938_v1  }
 0x67f   : > { %1956 = vperm.xlu1 %2699, %v1939_v41  }
 0x681   : > { %1947 = vperm.xlu0 %2698, %v1936_v44  }
 0x683   : > { %1959 = vperm.xlu1 %2699, %v1940_v40  }
 0x687   : > { %1962 = vperm.xlu1 %2699, %v1941_v37  }
 0x68b   : > { %1965 = vperm.xlu1 %2699, %v1942_v43  }
 0x6af   : > { %1590 = vadd.xlane.f32.xlu1 %v1589_v46 }
 0x6c0   : > { %1968 = vperm.xlu1 %2699, %v1943_v39  }
 0x6e3   : > { %v1585_v42 = vpop.xlane.xlu1 %1584 }
 0x6e4   : > { %v1582_v24 = vpop.xlane.xlu0 %1581  ;;  %v1781_v16 = vmax.f32 %v1585_v42, 1e-20 }
 0x6e5   : > { %v1780_v62 = vmax.f32 %v1582_v24, 1e-20 }
 0x6e7   : > { %v1579_v53 = vpop.xlane.xlu1 %1578 }
 0x6e8   : > { %v1576_v54 = vpop.xlane.xlu0 %1575  ;;  %v1779_v6 = vmax.f32 %v1579_v53, 1e-20 }
 0x6e9   : > { %v1778_v5 = vmax.f32 %v1576_v54, 1e-20 }
 0x6eb   : > { %2767 = vrcp.f32 %v1778_v5 }
 0x6ec   : > { %2769 = vrcp.f32 %v1779_v6 }
 0x6ed   : > { %2771 = vrcp.f32 %v1780_v62 }
 0x6ee   : > { %2773 = vrcp.f32 %v1781_v16 }
 0x6f3   : > { %v1597_v57 = vpop.xlane.xlu1 %1596 }
 0x6f4   : > { %v1594_v51 = vpop.xlane.xlu0 %1593  ;;  %v1785_v48 = vmax.f32 %v1597_v57, 1e-20 }
 0x6f5   : > { %v2768_v56 = vpop.eup %2767  ;;  %v1784_v34 = vmax.f32 %v1594_v51, 1e-20 }
 0x6f6   : > { %v2770_v17 = vpop.eup %2769  ;;  %v1794_v63 = vsel %vm485_vm4, %v2768_v56, 0.0 }
 0x6f7   : > { %v1951_v58 = vpop.permute.xlu1 %1950  ;;  %v1795_v3 = vsel %vm486_vm5, %v2770_v17, 0.0  ;;  %v2772_v33 = vpop.eup %2771 }
 0x6f8   : > { %v1588_v31 = vpop.xlane.xlu0 %1587  ;;  %vm1971_vm1 = vcmp.eq.s32.totalorder %v3466_v52, %v1951_v58  ;;  %v2774_v1 = vpop.eup %2773  ;;  %v1796_v40 = vsel %vm487_vm6, %v2772_v33, 0.0  ;;  %v2718_v33 = vld [vmem:[%s3607_s8 + $0x38] sm:$0xff]  }
 0x6f9   : > { %v2407_v15 = vsel %vm1971_vm1, 1.0, %v2920_v7  ;;  %v1782_v22 = vmax.f32 %v1588_v31, 1e-20  ;;  %v1797_v46 = vsel %vm488_vm7, %v2774_v1, 0.0 }
 0x6fb   : > { %v1954_v30 = vpop.permute.xlu1 %1953  ;;  %2775 = vrcp.f32 %v1782_v22 }
 0x6fc   : > { %vm1972_vm3 = vcmp.eq.s32.totalorder %v3466_v52, %v1954_v30  ;;  %2777 = vrcp.f32 %v1784_v34  ;;  %v2714_v34 = vld [vmem:[%s3607_s8 + $0x18] sm:$0xff]  }
 0x6fd   : > { %v2408_v60 = vsel %vm1972_vm3, 1.0, %v2920_v7  ;;  %2779 = vrcp.f32 %v1785_v48 }
 0x6ff   : > { %v1957_v10 = vpop.permute.xlu1 %1956 }
 0x700   : > { %vm1973_vm2 = vcmp.eq.s32.totalorder %v3466_v52, %v1957_v10  ;;  %v1948_v11 = vpop.permute.xlu0 %1947 }
 0x701   : > { %v2409_v45 = vsel %vm1973_vm2, 1.0, %v2920_v7  ;;  %vm1970_vm13 = vcmp.eq.s32.totalorder %v3466_v52, %v1948_v11 }
 0x702   : > { %v1995_v35 = vpack.c.bf16 %v2409_v45, %v2408_v60  ;;  %v2406_v18 = vsel %vm1970_vm13, 1.0, %v2920_v7 }
 0x703   : > { %v1994_v49 = vpack.c.bf16 %v2407_v15, %v2406_v18  ;;  %v1960_v55 = vpop.permute.xlu1 %1959 }
 0x704   : > { %vm1974_vm14 = vcmp.eq.s32.totalorder %v3466_v52, %v1960_v55 }
 0x705   : > { %2592 = vmatprep.mubr.msk.bf16.mxu0 %vm460_vm9, %v1994_v49  ;;  %v2410_v12 = vsel %vm1974_vm14, 1.0, %v2920_v7  ;;  %v2776_v42 = vpop.eup %2775 }
 0x706   : > { %2593 = vmatmul.mubr.msk.bf16.vlgmr.msra.gmra.mrb[32].mxu0 %vm460_vm9, %v1995_v35  ;;  %v1798_v57 = vsel %vm489_vm8, %v2776_v42, 0.0  ;;  %v2778_v51 = vpop.eup %2777 }
 0x707   : > { %v1963_v61 = vpop.permute.xlu1 %1962  ;;  %v2780_v11 = vpop.eup %2779  ;;  %v1800_v15 = vsel %vm491_vm10, %v2778_v51, 0.0 }
 0x708   : > { %vm1975_vm15 = vcmp.eq.s32.totalorder %v3466_v52, %v1963_v61  ;;  %v1801_v61 = vsel %vm492_vm12, %v2780_v11, 0.0 }
 0x709   : > { %v2411_v4 = vsel %vm1975_vm15, 1.0, %v2920_v7 }
 0x70a   : > { %v1996_v20 = vpack.c.bf16 %v2411_v4, %v2410_v12 }
 0x70b   : > { %v1966_v58 = vpop.permute.xlu1 %1965 }
 0x70c   : > { %2596 = vmatprep.mubr.msk.bf16.mxu0 %vm460_vm9, %v1996_v20  ;;  %vm1976_vm4 = vcmp.eq.s32.totalorder %v3466_v52, %v1966_v58 }
 0x70d   : > { %v2412_v19 = vsel %vm1976_vm4, 1.0, %v2920_v7 }
 0x727   : > { %v1639_v38 = vpop.f32.mrb[20].mxu0 }
 0x728   : > { %v1802_v25 = vmul.f32 %v1794_v63, %v1639_v38  ;;  %v2558_v2 = vpop.f32.mrb[21].mxu0 }
 0x729   : > { %v1642_v29 = vpop.f32.mrb[22].mxu0 }
 0x72a   : > { %v1816_v36 = vadd.f32 %v3486_v47, %v1802_v25  ;;  %v1803_v13 = vmul.f32 %v1795_v3, %v1642_v29  ;;  %v2559_v14 = vpop.f32.mrb[23].mxu0 }
 0x72b   : > { %v2717_v14 = vld [vmem:[%s3607_s8 + $0x30] sm:$0xff]  }
 0x72c   : > { %v1817_v0 = vadd.f32 %v3486_v47, %v1803_v13  ;;  %v1824_v21 = vmax.f32 %v1816_v36, 0.0  ;;  %v2715_v36 = vld [vmem:[%s3607_s8 + $0x20] sm:$0xff]   ;;  %v2716_v13 = vld [vmem:[%s3607_s8 + $0x28] sm:$0xff]  }
 0x72e   : > { %v1825_v41 = vmax.f32 %v1817_v0, 0.0 }
 0x72f   : > { %v1683_v44 = vpop.f32.mrb[24].mxu0 }
 0x730   : > { %v1832_v26 = vpack.c.bf16 %v1825_v41, %v1824_v21  ;;  %v1804_v32 = vmul.f32 %v1796_v40, %v1683_v44  ;;  %v2564_v37 = vpop.f32.mrb[25].mxu0  ;;  %v2399_v41 = vld [vmem:[%s3605_s6] ss:$0 sm:$0xff] }
 0x731   : > { %v1686_v43 = vpop.f32.mrb[26].mxu0 }
 0x732   : > { %v1818_v23 = vadd.f32 %v3486_v47, %v1804_v32  ;;  %v1805_v50 = vmul.f32 %v1797_v46, %v1686_v43  ;;  %v2565_v39 = vpop.f32.mrb[27].mxu0  ;;  %2582 = vmatprep.mubr.msk.bf16.mxu1 %vm538_vm0, %v1832_v26 }
 0x734   : > { %v1819_v24 = vadd.f32 %v3486_v47, %v1805_v50  ;;  %v1826_v53 = vmax.f32 %v1818_v23, 0.0 }
 0x736   : > { %v1827_v27 = vmax.f32 %v1819_v24, 0.0 }
 0x737   : > { %v1727_v54 = vpop.f32.mrb[12].mxu1 }
 0x738   : > { %v1833_v30 = vpack.c.bf16 %v1827_v27, %v1826_v53  ;;  %v1806_v28 = vmul.f32 %v1798_v57, %v1727_v54  ;;  %v2570_v31 = vpop.f32.mrb[13].mxu1 }
 0x739   : > { %v1730_v10 = vpop.f32.mrb[14].mxu1 }
 0x73a   : > { %v2571_v60 = vpop.f32.mrb[15].mxu1  ;;  %2583 = vmatmul.mubr.msk.bf16.vlgmr.msra.gmra.mrb[16].mxu1 %vm538_vm0, %v1833_v30  ;;  %v1820_v63 = vadd.f32 %v3486_v47, %v1806_v28 }
 0x73b   : > { %v1771_v45 = vpop.f32.mrb[28].mxu0 }
 0x73c   : > { %v1808_v35 = vmul.f32 %v1800_v15, %v1771_v45  ;;  %v2576_v18 = vpop.f32.mrb[29].mxu0  ;;  %v1591_v49 = vpop.xlane.xlu1 %1590 }
 0x73d   : > { %v1783_v55 = vmax.f32 %v1591_v49, 1e-20  ;;  %v1774_v8 = vpop.f32.mrb[30].mxu0 }
 0x73e   : > { %v1822_v12 = vadd.f32 %v3486_v47, %v1808_v35  ;;  %v1809_v4 = vmul.f32 %v1801_v61, %v1774_v8  ;;  %v2577_v20 = vpop.f32.mrb[31].mxu0 }
 0x73f   : > { %2781 = vrcp.f32 %v1783_v55 }
 0x740   : > { %v1823_v5 = vadd.f32 %v3486_v47, %v1809_v4  ;;  %v1969_v6 = vpop.permute.xlu1 %1968  ;;  %v1830_v62 = vmax.f32 %v1822_v12, 0.0 }
 0x741   : > { %vm1977_vm5 = vcmp.eq.s32.totalorder %v3466_v52, %v1969_v6  ;;  %v1828_v52 = vmax.f32 %v1820_v63, 0.0 }
 0x742   : > { %v1831_v16 = vmax.f32 %v1823_v5, 0.0  ;;  %v2413_v56 = vsel %vm1977_vm5, 1.0, %v2920_v7  ;;  %v2711_v7 = vld [vmem:[%s3607_s8] sm:$0xff]  }
 0x743   : > { %v1997_v9 = vpack.c.bf16 %v2413_v56, %v2412_v19  ;;  %2600 = vmatprep.subr.bf16.mxu1 %v2711_v7 }
 0x744   : > { %v1835_v17 = vpack.c.bf16 %v1831_v16, %v1830_v62  ;;  %2601 = vmatpush3.bf16.msra.mxu1 %v2711_v7 }
 0x745   : > { %2597 = vmatmul.mubr.msk.bf16.gmra.mrb[36].mxu0 %vm460_vm9, %v1997_v9  ;;  %2602 = vmatprep.subr.bf16.mxu1 %v2712_v59 }
 0x748   : > { %2603 = vmatpush3.bf16.msra.mxu1 %v2712_v59 }
 0x749   : > { %v2782_v22 = vpop.eup %2781 }
 0x74a   : > { %v1799_v38 = vsel %vm490_vm11, %v2782_v22, 0.0 }
 0x74b   : > { %v1807_v25 = vmul.f32 %v1799_v38, %v1730_v10 }
 0x74d   : > { %v1821_v2 = vadd.f32 %v3486_v47, %v1807_v25  ;;  %v2713_v47 = vld [vmem:[%s3607_s8 + $0x10] sm:$0xff]  }
 0x74e   : > { %2604 = vmatprep.subr.bf16.mxu1 %v2713_v47 }
 0x74f   : > { %v1829_v29 = vmax.f32 %v1821_v2, 0.0  ;;  %2605 = vmatpush3.bf16.msra.mxu1 %v2713_v47 }
 0x750   : > { %2606 = vmatprep.subr.bf16.mxu1 %v2714_v34 }
 0x751   : > { %v1834_v3 = vpack.c.bf16 %v1829_v29, %v1828_v52 }
 0x753   : > { %2586 = vmatprep.mubr.msk.bf16.mxu1 %vm538_vm0, %v1834_v3  ;;  %2607 = vmatpush3.bf16.msra.mxu1 %v2714_v34 }
 0x754   : > { %2587 = vmatmul.mubr.msk.bf16.gmra.mrb[20].mxu1 %vm538_vm0, %v1835_v17  ;;  %2608 = vmatprep.subr.bf16.mxu1 %v2715_v36 }
 0x757   : > { %2609 = vmatpush3.bf16.msra.mxu1 %v2715_v36 }
 0x758   : > { %2610 = vmatprep.subr.bf16.mxu1 %v2716_v13 }
 0x75b   : > { %2611 = vmatpush3.bf16.msra.mxu1 %v2716_v13 }
 0x75c   : > { %2612 = vmatprep.subr.bf16.mxu1 %v2717_v14 }
 0x75f   : > { %2613 = vmatpush3.bf16.msra.mxu1 %v2717_v14 }
 0x760   : > { %2614 = vmatprep.subr.bf16.mxu1 %v2718_v33 }
 0x763   : > { %2615 = vmatpush3.bf16.msra.mxu1 %v2718_v33 }
 0x7d9   : > { %v2594_v48 = vpop.f32.mrb[32].mxu0 }
 0x7da   : > { %v2052_v0 = vpop.f32.mrb[33].mxu0 }
 0x7db   : > { %v2595_v1 = vpop.f32.mrb[34].mxu0 }
 0x7dc   : > { %v2055_v21 = vpop.f32.mrb[35].mxu0 }
 0x80d   : > { %v2584_v44 = vpop.f32.mrb[16].mxu1 }
 0x80e   : > { %v1914_v40 = vadd.f32 %v2584_v44, %v2399_v41  ;;  %v1905_v26 = vpop.f32.mrb[17].mxu1 }
 0x80f   : > { %v1906_v32 = vadd.f32 %v2399_v41, %v1905_v26  ;;  %v2585_v37 = vpop.f32.mrb[18].mxu1 }
 0x810   : > { %v2085_v43 = vmul.f32 %v2594_v48, %v1914_v40  ;;  %v1917_v46 = vadd.f32 %v2585_v37, %v2399_v41  ;;  %v1908_v23 = vpop.f32.mrb[19].mxu1 }
 0x811   : > { %v2083_v50 = vmul.f32 %v2052_v0, %v1906_v32  ;;  %v1909_v39 = vadd.f32 %v2399_v41, %v1908_v23 }
 0x812   : > { %v2086_v42 = vmul.f32 %v2595_v1, %v1917_v46 }
 0x813   : > { %v2084_v24 = vmul.f32 %v2055_v21, %v1909_v39 }
 0x814   : > { %v2092_v53 = vpack.c.bf16 %v2086_v42, %v2085_v43 }
 0x815   : > { %v2091_v27 = vpack.c.bf16 %v2084_v24, %v2083_v50 }
 0x817   : > { %2616 = vmatprep.mubr.bf16.mxu1 %v2091_v27 }
 0x818   : > { %2617 = vmatmul.mubr.bf16.vlgmr.msra.gmra.mrb[24].mxu1 %v2092_v53  ;;  %v2598_v54 = vpop.f32.mrb[36].mxu0 }
 0x819   : > { %v2068_v57 = vpop.f32.mrb[37].mxu0 }
 0x81a   : > { %v2599_v51 = vpop.f32.mrb[38].mxu0 }
 0x81b   : > { %v2071_v58 = vpop.f32.mrb[39].mxu0 }
 0x827   : > { %v2588_v30 = vpop.f32.mrb[20].mxu1 }
 0x828   : > { %v1930_v28 = vadd.f32 %v2588_v30, %v2399_v41  ;;  %v1921_v31 = vpop.f32.mrb[21].mxu1 }
 0x829   : > { %v1922_v10 = vadd.f32 %v2399_v41, %v1921_v31  ;;  %v2589_v11 = vpop.f32.mrb[22].mxu1 }
 0x82a   : > { %v2089_v60 = vmul.f32 %v2598_v54, %v1930_v28  ;;  %v1933_v45 = vadd.f32 %v2589_v11, %v2399_v41  ;;  %v1924_v15 = vpop.f32.mrb[23].mxu1 }
 0x82b   : > { %v2087_v35 = vmul.f32 %v2068_v57, %v1922_v10  ;;  %v1925_v18 = vadd.f32 %v2399_v41, %v1924_v15 }
 0x82c   : > { %v2090_v49 = vmul.f32 %v2599_v51, %v1933_v45 }
 0x82d   : > { %v2088_v55 = vmul.f32 %v2071_v58, %v1925_v18 }
 0x82e   : > { %v2094_v8 = vpack.c.bf16 %v2090_v49, %v2089_v60 }
 0x82f   : > { %v2093_v61 = vpack.c.bf16 %v2088_v55, %v2087_v35 }
 0x831   : > { %2620 = vmatprep.mubr.bf16.mxu1 %v2093_v61 }
 0x832   : > { %2621 = vmatmul.mubr.bf16.gmra.mrb[28].mxu1 %v2094_v8 }
 0x8eb   : > { %v2618_v12 = vpop.f32.mrb[24].mxu1 }
 0x8ec   : > { %2226 = vst [vmem:[%s402_s26 + $0x10] sm:$0xff] %v2618_v12  ;;  %v2193_v4 = vpop.f32.mrb[25].mxu1 }
 0x8ed   : > { %2224 = vst [vmem:[%s402_s26] sm:$0xff] %v2193_v4  ;;  %v2619_v20 = vpop.f32.mrb[26].mxu1 }
 0x8ee   : > { %2227 = vst [vmem:[%s402_s26 + $0x18] sm:$0xff] %v2619_v20  ;;  %v2196_v5 = vpop.f32.mrb[27].mxu1 }
 0x8ef   : > { %2225 = vst [vmem:[%s402_s26 + $0x8] sm:$0xff] %v2196_v5 }
 0x905   : > { %v2622_v6 = vpop.f32.mrb[28].mxu1 }
 0x906   : > { %2230 = vst [vmem:[%s402_s26 + $0x30] sm:$0xff] %v2622_v6  ;;  %v2209_v19 = vpop.f32.mrb[29].mxu1 }
 0x907   : > { %2228 = vst [vmem:[%s402_s26 + $0x20] sm:$0xff] %v2209_v19  ;;  %v2623_v62 = vpop.f32.mrb[30].mxu1 }
 0x908   : > { %2231 = vst [vmem:[%s402_s26 + $0x38] sm:$0xff] %v2623_v62  ;;  %v2212_v16 = vpop.f32.mrb[31].mxu1 }
 0x909   : > { %2229 = vst [vmem:[%s402_s26 + $0x28] sm:$0xff] %v2212_v16 }
 0x90a   : > { %2854 = shalt.err (!%p2851_p9)
}
 0x90b   : > { %s2855_s20 = scalar_lea.hbm %s3555_s15, 1024  ;;  %s2859_s26 = scalar_lea.hbm %s3608_s9, 2048 }
 0x90c   : > { %p2856_p2 = scmp.ne.s32.totalorder %s3555_s15, %s2855_s20  ;;  %p2860_p11 = scmp.lt.u32.totalorder %s3555_s15, %s3608_s9 }
 0x90d   : > { %p2861_p1 = scmp.lt.u32.totalorder %s2859_s26, %s2855_s20  ;;  %p2863_p6 = scmp.lt.u32.totalorder %s2855_s20, %s3555_s15 }
 0x90e   : > { %p2857_p0 = pnand %p2856_p2, %p3069_p12 }
 0x90f   : > { %p2862_p4 = por %p2861_p1, %p2860_p11 }
 0x910   : > { %p2858_p5 = pneg %p2857_p0 }
 0x911   : > { %p2864_p8 = por %p2863_p6, %p2862_p4 }
 0x913   : > { %p2865_p10 = pnand %p2864_p8, %p2858_p5 }
 0x915   : > { %2868 = shalt.err (!%p2865_p10)
}
 0x916   : > { %s2926_s24 = smov 128   ;;  %s2927_s13 = smov 8  }
 0x917   : > { %2633 = dma.vmem_to_hbm [thread:$0]  (%p3069_p12), %s3550_s17, 1024, %s3555_s15, %s2233_s16, %s2926_s24, %s2926_s24, %s2927_s13  }
 0x918 PF: > { %s3628_s21 = sld [smem:[#allocation11_spill]]  ;;  %s2262_s25 = sand.u32 1, %s2899_s30  }
 0x919   : > { %p3630_p3 = scmp.ge.s32.totalorder %s2911_s12, 2  ;;  %s2263_s27 = scalar_lea.sflag [#allocation4], %s2262_s25 }
 0x91e   : > { %p3629_p13 = scmp.ne.s32.totalorder %s3628_s21, 0 }
 0x920   : > { %p2644_p7 = pnand %p3630_p3, %p3629_p13 }
 0x922   : > { %2894 = dma.done.wait (!%p2644_p7), %s2263_s27, 1024  }
 0x923   : > { %2896 = vsyncadd (!%p2644_p7), %s2263_s27, 4294966272  ;;  %s3631_s12 = sld [smem:[#allocation12_spill]]  ;;  %s3632_s30 = smov %s2903_s10 }
 0x924   : > { %s3633_s10 = smov %s2907_s11  ;;  %s3634_s11 = smov %s3065_s28 }
 0x929   : > { %p23_p9 = scmp.ge.s32.totalorder %s3631_s12, 4  }
 0x92b   :  { %25 = sbr.rel (!%p23_p9) target bundleno = 6 (0x6), region = 113 }
 0x932   :  { %2268 = vsyncpa [#allocation3], 1 }
 0x933   :  { %2270 = vsyncpa [#allocation3 + $0x1], 1 }
 0x934   :  { %2271 = vsyncpa [#allocation6], 1 }
 0x935   :  { %2272 = vsyncpa [#allocation4], 1 }
 0x936   :  { %2274 = vsyncpa [#allocation4 + $0x1], 1 }

</bundles_post_ra>
